<compile_context>
chip_gen: v7x
topology: tpu7x:2x2x1
jax: 0.10.0
libtpu: 0.0.40
codegen_flags: <defaults>
</compile_context>

<pallas_src>
import functools

import jax
import jax.numpy as jnp
from jax.experimental import pallas as pl
from jax.experimental.pallas import tpu as pltpu

_LANE = 128
_VMEM_LIMIT = 32 * 1024 * 1024   # safe on v5e/v6e/v7x; tiles here are tiny.
_NEG_SLOPE = 0.01                # PyTorch LeakyReLU default


def _round_up(x, m):
    return (x + m - 1) // m * m


def _leaky_relu(x, slope=_NEG_SLOPE):
    return jnp.where(x > 0, x, slope * x)


def _pad2(a, rows, cols, dtype=jnp.float32):
    out = jnp.zeros((rows, cols), dtype)
    return out.at[:a.shape[0], :a.shape[1]].set(a.astype(dtype))


# --------------------------------------------------------------------------- #
# Kernels
# --------------------------------------------------------------------------- #
def _linear_kernel(x_ref, w_ref, o_ref):
    """kan_line: one row-tile of h0 = x @ W_lin."""
    o_ref[...] = jnp.dot(x_ref[...], w_ref[...],
                         preferred_element_type=jnp.float32).astype(o_ref.dtype)


def _sage_kernel(a_ref, hk_ref, hm_ref, wcat_ref, b_ref, o_ref,
                 acc_ref, deg_ref, cat_ref):
    """One SAGEConv('mean') layer, tiled over (row tile i, reduction tile k).

    acc_ref : (TM, H)   running A @ h for this row tile
    deg_ref : (TM, 1)   running in-degree for this row tile
    cat_ref : (TM, 2H)  staging buffer for the fused [h | neigh] matmul
    """
    k = pl.program_id(1)
    h_pad = hm_ref.shape[1]

    @pl.when(k == 0)
    def _init():
        acc_ref[...] = jnp.zeros_like(acc_ref)
        deg_ref[...] = jnp.zeros_like(deg_ref)

    # bf16 adjacency holds exact 0/1 values; promote to f32 for exact matmul.
    a = a_ref[...].astype(jnp.float32)
    acc_ref[...] += jnp.dot(a, hk_ref[...], preferred_element_type=jnp.float32)
    deg_ref[...] += jnp.sum(a, axis=1, keepdims=True)

    @pl.when(k == pl.num_programs(1) - 1)
    def _finalize():
        # Mean aggregation; isolated nodes (deg == 0) get a zero neighbor term.
        inv_deg = 1.0 / jnp.maximum(deg_ref[...], 1.0)
        neigh = acc_ref[...] * inv_deg
        # Fused single MXU pass with K = 2H; residual is folded into wcat
        # (self block is W_self^T + I), so leaky_relu(m) == leaky_relu(m0 + h).
        cat_ref[:, :h_pad] = hm_ref[...]
        cat_ref[:, h_pad:] = neigh
        m = jnp.dot(cat_ref[...], wcat_ref[...],
                    preferred_element_type=jnp.float32) + b_ref[...]
        o_ref[...] = _leaky_relu(m).astype(o_ref.dtype)


def _pool_readout_kernel(h_ref, wout_ref, bout_ref, o_ref, acc_ref, *,
                         pooling, num_nodes, tm):
    """Masked node pooling (avg/sum/max) + Linear + Sigmoid readout."""
    i = pl.program_id(0)

    @pl.when(i == 0)
    def _init():
        if pooling == 'max':
            acc_ref[...] = jnp.full(acc_ref.shape, -jnp.inf, acc_ref.dtype)
        else:
            acc_ref[...] = jnp.zeros_like(acc_ref)

    rows = jax.lax.broadcasted_iota(jnp.int32, h_ref.shape, 0) + i * tm
    valid = rows < num_nodes
    h = h_ref[...]
    if pooling == 'max':
        tile = jnp.where(valid, h, -jnp.inf)
        acc_ref[...] = jnp.maximum(acc_ref[...],
                                   jnp.max(tile, axis=0, keepdims=True))
    else:
        tile = jnp.where(valid, h, 0.0)
        acc_ref[...] += jnp.sum(tile, axis=0, keepdims=True)

    @pl.when(i == pl.num_programs(0) - 1)
    def _finalize():
        y = acc_ref[...]
        if pooling == 'avg':
            y = y * (1.0 / num_nodes)
        logits = jnp.dot(y, wout_ref[...],
                         preferred_element_type=jnp.float32) + bout_ref[...]
        o_ref[...] = jax.nn.sigmoid(logits).astype(o_ref.dtype)


# --------------------------------------------------------------------------- #
# Wrapper
# --------------------------------------------------------------------------- #
def mlpgnn_two_forward(x, adj, params, *, num_layers, pooling, tm=128, tk=128):
    """x: (N, in_feat) node features; adj: (N, N), adj[i, j] = 1 iff edge j->i."""
    if pooling not in ('avg', 'sum', 'max'):
        raise ValueError('No pooling found!!!!')

    w_lin, w_self, w_neigh, b_sage, w_out, b_out = params
    n, in_feat = x.shape
    hidden = w_lin.shape[1]
    out_dim = w_out.shape[1]
    n_sage = num_layers - 1

    n_pad = _round_up(n, max(tm, tk))
    in_pad = _round_up(in_feat, _LANE)
    h_pad = _round_up(hidden, _LANE)
    out_pad = _round_up(out_dim, _LANE)
    mt, kt = n_pad // tm, n_pad // tk

    # ---- Pad operands to lane/tile-friendly shapes (zeros preserve math). ----
    x_p = _pad2(x, n_pad, in_pad)
    adj_p = _pad2(adj, n_pad, n_pad, jnp.bfloat16)       # 0/1 exact in bf16
    w_lin_p = _pad2(w_lin, in_pad, h_pad)
    w_out_p = _pad2(w_out, h_pad, out_pad)
    b_out_p = _pad2(b_out.reshape(1, -1), 1, out_pad)

    # Fuse per-layer weights ([W_self^T + I ; W_neigh^T]) and fold the residual.
    eye = jnp.eye(h_pad, dtype=jnp.float32)
    w_cat, b_cat = [], []
    for l in range(n_sage):
        ws = _pad2(w_self[l], h_pad, h_pad) + eye
        wn = _pad2(w_neigh[l], h_pad, h_pad)
        w_cat.append(jnp.concatenate([ws, wn], axis=0))         # (2H, H)
        b_cat.append(_pad2(b_sage[l].reshape(1, -1), 1, h_pad))

    # ---- kan_line: h0 = x @ W_lin, tiled over node rows. ---------------------
    h = pl.pallas_call(
        _linear_kernel,
        out_shape=jax.ShapeDtypeStruct((n_pad, h_pad), jnp.float32),
        grid=(mt,),
        in_specs=[pl.BlockSpec((tm, in_pad), lambda i: (i, 0)),
                  pl.BlockSpec((in_pad, h_pad), lambda i: (0, 0))],
        out_specs=pl.BlockSpec((tm, h_pad), lambda i: (i, 0)),
        compiler_params=pltpu.CompilerParams(
            dimension_semantics=("parallel",),
            vmem_limit_bytes=_VMEM_LIMIT),
    )(x_p, w_lin_p)

    # ---- SAGEConv('mean') layers: tiled A@h with K reduction + fused epilogue.
    sage_cost = pl.CostEstimate(
        flops=2 * n_pad * n_pad * h_pad + 4 * n_pad * h_pad * h_pad,
        transcendentals=0,
        bytes_accessed=(n_pad * n_pad * 2            # bf16 adjacency
                        + 3 * n_pad * h_pad * 4      # h read (x2) + h write
                        + 2 * h_pad * h_pad * 4))    # fused weights
    for l in range(n_sage):
        h = pl.pallas_call(
            _sage_kernel,
            out_shape=jax.ShapeDtypeStruct((n_pad, h_pad), jnp.float32),
            grid=(mt, kt),
            in_specs=[
                pl.BlockSpec((tm, tk), lambda i, k: (i, k)),        # A tile
                pl.BlockSpec((tk, h_pad), lambda i, k: (k, 0)),     # h (reduction rows)
                pl.BlockSpec((tm, h_pad), lambda i, k: (i, 0)),     # h (self/residual rows)
                pl.BlockSpec((2 * h_pad, h_pad), lambda i, k: (0, 0)),
                pl.BlockSpec((1, h_pad), lambda i, k: (0, 0)),
            ],
            out_specs=pl.BlockSpec((tm, h_pad), lambda i, k: (i, 0)),
            scratch_shapes=[pltpu.VMEM((tm, h_pad), jnp.float32),
                            pltpu.VMEM((tm, 1), jnp.float32),
                            pltpu.VMEM((tm, 2 * h_pad), jnp.float32)],
            compiler_params=pltpu.CompilerParams(
                dimension_semantics=("parallel", "arbitrary"),
                vmem_limit_bytes=_VMEM_LIMIT),
            cost_estimate=sage_cost,
        )(adj_p, h, h, w_cat[l], b_cat[l])

    # ---- Pooling over nodes + Readout (Linear + Sigmoid). ---------------------
    out = pl.pallas_call(
        functools.partial(_pool_readout_kernel,
                          pooling=pooling, num_nodes=n, tm=tm),
        out_shape=jax.ShapeDtypeStruct((1, out_pad), jnp.float32),
        grid=(mt,),
        in_specs=[pl.BlockSpec((tm, h_pad), lambda i: (i, 0)),
                  pl.BlockSpec((h_pad, out_pad), lambda i: (0, 0)),
                  pl.BlockSpec((1, out_pad), lambda i: (0, 0))],
        out_specs=pl.BlockSpec((1, out_pad), lambda i: (0, 0)),
        scratch_shapes=[pltpu.VMEM((1, h_pad), jnp.float32)],
        compiler_params=pltpu.CompilerParams(
            dimension_semantics=("arbitrary",),
            vmem_limit_bytes=_VMEM_LIMIT),
    )(h, w_out_p, b_out_p)

    return out[:, :out_dim]


# --------------------------------------------------------------------------- #
# Parameters & pure-JAX reference
# --------------------------------------------------------------------------- #
def init_params(key, in_feat, hidden_feat, out, num_layers):
    """Deterministic synthetic parameters, stored pre-transposed as [in, out]."""
    n_sage = num_layers - 1
    ks = jax.random.split(key, 6)
    w_lin = jax.random.normal(ks[0], (in_feat, hidden_feat), jnp.float32) * 0.1
    w_self = jax.random.normal(ks[1], (n_sage, hidden_feat, hidden_feat), jnp.float32) * 0.1
    w_neigh = jax.random.normal(ks[2], (n_sage, hidden_feat, hidden_feat), jnp.float32) * 0.1
    b_sage = jnp.zeros((n_sage, 1, hidden_feat), jnp.float32)   # DGL SAGEConv bias init = 0
    w_out = jax.random.normal(ks[3], (hidden_feat, out), jnp.float32) * 0.1
    b_out = jax.random.normal(ks[4], (1, out), jnp.float32) * 0.1
    return (w_lin, w_self, w_neigh, b_sage, w_out, b_out)


def reference_forward(x, adj, params, *, num_layers, pooling):
    """Pure-JAX reference (full-precision matmuls) for a sanity check."""
    w_lin, w_self, w_neigh, b_sage, w_out, b_out = params
    hp = jax.lax.Precision.HIGHEST
    deg = jnp.sum(adj, axis=1, keepdims=True)
    a_norm = adj / jnp.maximum(deg, 1.0)
    h = jnp.dot(x, w_lin, precision=hp)
    for l in range(num_layers - 1):
        neigh = jnp.dot(a_norm, h, precision=hp)
        m = (jnp.dot(h, w_self[l], precision=hp)
             + jnp.dot(neigh, w_neigh[l], precision=hp) + b_sage[l])
        h = _leaky_relu(m + h)
    if pooling == 'avg':
        y = jnp.mean(h, axis=0, keepdims=True)
    elif pooling == 'sum':
        y = jnp.sum(h, axis=0, keepdims=True)
    else:
        y = jnp.max(h, axis=0, keepdims=True)
    return jax.nn.sigmoid(jnp.dot(y, w_out, precision=hp) + b_out)


# --------------------------------------------------------------------------- #
# Main
# --------------------------------------------------------------------------- #
if __name__ == "__main__":
    in_feat, hidden_feat, out_feat, num_layers = 8, 32, 4, 3   # -> 2 SAGE layers

    key = jax.random.PRNGKey(0)
    k_p, k_x1, k_a1, k_x2, k_a2 = jax.random.split(key, 5)
    params = init_params(k_p, in_feat, hidden_feat, out_feat, num_layers)

    fwd = jax.jit(mlpgnn_two_forward,
                  static_argnames=("num_layers", "pooling", "tm", "tk"))

    # Case 1: module-scale graph (N=16), single tile.
    n1 = 16
    x1 = jax.random.normal(k_x1, (n1, in_feat), jnp.float32)
    a1 = (jax.random.uniform(k_a1, (n1, n1)) < 0.3).astype(jnp.float32)
    a1 = a1 * (1.0 - jnp.eye(n1, dtype=jnp.float32))            # no self-loops

    # Case 2: multi-tile graph (N=300 -> padded to 384 -> 3x3 grid of 128-tiles).
    n2 = 300
    x2 = jax.random.normal(k_x2, (n2, in_feat), jnp.float32)
    a2 = (jax.random.uniform(k_a2, (n2, n2)) < 0.05).astype(jnp.float32)
    a2 = a2 * (1.0 - jnp.eye(n2, dtype=jnp.float32))

    cases = ((x1, a1, 'avg'), (x1, a1, 'sum'), (x2, a2, 'max'))
    for x, adj, pooling in cases:
        got = jax.block_until_ready(
            fwd(x, adj, params, num_layers=num_layers, pooling=pooling))
        ref = reference_forward(x, adj, params,
                                num_layers=num_layers, pooling=pooling)
        assert got.shape == (1, out_feat)
        assert jnp.allclose(got, ref, atol=1e-3, rtol=1e-3), (pooling, got, ref)

    print("KERNEL_OK")
</pallas_src>

<mosaic_0001>
module attributes {stable_mosaic.version = 11 : i64} {
  func.func @_linear_kernel(%arg0: i32, %arg1: memref<128x128xf32, #tpu.memory_space<vmem>>, %arg2: memref<128x128xf32, #tpu.memory_space<vmem>>, %arg3: memref<128x128xf32, #tpu.memory_space<vmem>>) attributes {dimension_semantics = [#tpu.dimension_semantics<parallel>], iteration_bounds = array<i64: 1>, scalar_prefetch = 0 : i64, scratch_operands = 0 : i64, tpu.core_type = #tpu.core_type<tc>, window_params = [{transform_indices = @transform_0, window_bounds = array<i64: 128, 128>}, {pipeline_mode = #tpu.pipeline_mode<synchronous>, transform_indices = @transform_1, window_bounds = array<i64: 128, 128>}, {transform_indices = @transform_2, window_bounds = array<i64: 128, 128>}]} {
    %c0 = arith.constant 0 : index
    %c0_0 = arith.constant 0 : index
    %0 = vector.load %arg1[%c0, %c0_0] : memref<128x128xf32, #tpu.memory_space<vmem>>, vector<128x128xf32>
    %c0_1 = arith.constant 0 : index
    %c0_2 = arith.constant 0 : index
    %1 = vector.load %arg2[%c0_1, %c0_2] : memref<128x128xf32, #tpu.memory_space<vmem>>, vector<128x128xf32>
    %cst = arith.constant dense<0.000000e+00> : vector<128x128xf32>
    %2 = tpu.matmul %0, %1, %cst {dimension_numbers = #tpu.dot_dimension_numbers<[1], [0], [0], [1], [0, 0, 1, 1], [], []>} : vector<128x128xf32>, vector<128x128xf32>, vector<128x128xf32> -> vector<128x128xf32>
    %c0_3 = arith.constant 0 : index
    %c0_4 = arith.constant 0 : index
    %3 = vector.load %arg3[%c0_3, %c0_4] : memref<128x128xf32, #tpu.memory_space<vmem>>, vector<128x128xf32>
    tpu.vector_store %arg3[%c0_3, %c0_4], %2 {strides = array<i32>} : memref<128x128xf32, #tpu.memory_space<vmem>>, vector<128x128xf32>,
    return
  }
  func.func @transform_0(%arg0: i32) -> (i32, i32) {
    %c0_i32 = arith.constant 0 : i32
    %c0_i32_0 = arith.constant 0 : i32
    return %arg0, %c0_i32 : i32, i32
  }
  func.func @transform_1(%arg0: i32) -> (i32, i32) {
    %c0_i32 = arith.constant 0 : i32
    %c0_i32_0 = arith.constant 0 : i32
    %c0_i32_1 = arith.constant 0 : i32
    return %c0_i32, %c0_i32_0 : i32, i32
  }
  func.func @transform_2(%arg0: i32) -> (i32, i32) {
    %c0_i32 = arith.constant 0 : i32
    %c0_i32_0 = arith.constant 0 : i32
    return %arg0, %c0_i32 : i32, i32
  }
}

module attributes {stable_mosaic.version = 11 : i64} {
  func.func @_sage_kernel(%arg0: i32, %arg1: i32, %arg2: memref<128x128xbf16, #tpu.memory_space<vmem>>, %arg3: memref<128x128xf32, #tpu.memory_space<vmem>>, %arg4: memref<128x128xf32, #tpu.memory_space<vmem>>, %arg5: memref<256x128xf32, #tpu.memory_space<vmem>>, %arg6: memref<1x128xf32, #tpu.memory_space<vmem>>, %arg7: memref<128x128xf32, #tpu.memory_space<vmem>>, %arg8: memref<128x128xf32, #tpu.memory_space<vmem>>, %arg9: memref<128x1xf32, #tpu.memory_space<vmem>>, %arg10: memref<128x256xf32, #tpu.memory_space<vmem>>) attributes {dimension_semantics = [#tpu.dimension_semantics<parallel>, #tpu.dimension_semantics<arbitrary>], iteration_bounds = array<i64: 1, 1>, scalar_prefetch = 0 : i64, scratch_operands = 3 : i64, tpu.core_type = #tpu.core_type<tc>, window_params = [{transform_indices = @transform_0, window_bounds = array<i64: 128, 128>}, {transform_indices = @transform_1, window_bounds = array<i64: 128, 128>}, {transform_indices = @transform_2, window_bounds = array<i64: 128, 128>}, {pipeline_mode = #tpu.pipeline_mode<synchronous>, transform_indices = @transform_3, window_bounds = array<i64: 256, 128>}, {pipeline_mode = #tpu.pipeline_mode<synchronous>, transform_indices = @transform_4, window_bounds = array<i64: 1, 128>}, {transform_indices = @transform_5, window_bounds = array<i64: 128, 128>}]} {
    %c0_i32 = arith.constant 0 : i32
    %0 = arith.cmpi eq, %arg1, %c0_i32 : i32
    %1 = arith.extui %0 : i1 to i32
    %c0_i32_0 = arith.constant 0 : i32
    %2 = arith.cmpi ne, %1, %c0_i32_0 : i32
    scf.if %2 {
      %cst_15 = arith.constant 0.000000e+00 : f32
      %18 = vector.broadcast %cst_15 : f32 to vector<128x128xf32>
      %c0_16 = arith.constant 0 : index
      %c0_17 = arith.constant 0 : index
      %19 = vector.load %arg8[%c0_16, %c0_17] : memref<128x128xf32, #tpu.memory_space<vmem>>, vector<128x128xf32>
      tpu.vector_store %arg8[%c0_16, %c0_17], %18 {strides = array<i32>} : memref<128x128xf32, #tpu.memory_space<vmem>>, vector<128x128xf32>,
      %cst_18 = arith.constant 0.000000e+00 : f32
      %20 = vector.broadcast %cst_18 : f32 to vector<128x1xf32>
      %c0_19 = arith.constant 0 : index
      %c0_20 = arith.constant 0 : index
      %21 = vector.load %arg9[%c0_19, %c0_20] : memref<128x1xf32, #tpu.memory_space<vmem>>, vector<128x1xf32>
      tpu.vector_store %arg9[%c0_19, %c0_20], %20 {strides = array<i32>} : memref<128x1xf32, #tpu.memory_space<vmem>>, vector<128x1xf32>,
    } else {
    }
    %c0 = arith.constant 0 : index
    %c0_1 = arith.constant 0 : index
    %3 = vector.load %arg2[%c0, %c0_1] : memref<128x128xbf16, #tpu.memory_space<vmem>>, vector<128x128xbf16>
    %4 = arith.extf %3 : vector<128x128xbf16> to vector<128x128xf32>
    %c0_2 = arith.constant 0 : index
    %c0_3 = arith.constant 0 : index
    %5 = vector.load %arg8[%c0_2, %c0_3] : memref<128x128xf32, #tpu.memory_space<vmem>>, vector<128x128xf32>
    %c0_4 = arith.constant 0 : index
    %c0_5 = arith.constant 0 : index
    %6 = vector.load %arg3[%c0_4, %c0_5] : memref<128x128xf32, #tpu.memory_space<vmem>>, vector<128x128xf32>
    %cst = arith.constant dense<0.000000e+00> : vector<128x128xf32>
    %7 = tpu.matmul %4, %6, %cst {dimension_numbers = #tpu.dot_dimension_numbers<[1], [0], [0], [1], [0, 0, 1, 1], [], []>} : vector<128x128xf32>, vector<128x128xf32>, vector<128x128xf32> -> vector<128x128xf32>
    %8 = arith.addf %5, %7 : vector<128x128xf32>
    %c0_6 = arith.constant 0 : index
    %c0_7 = arith.constant 0 : index
    %9 = vector.load %arg8[%c0_6, %c0_7] : memref<128x128xf32, #tpu.memory_space<vmem>>, vector<128x128xf32>
    tpu.vector_store %arg8[%c0_6, %c0_7], %8 {strides = array<i32>} : memref<128x128xf32, #tpu.memory_space<vmem>>, vector<128x128xf32>,
    %c0_8 = arith.constant 0 : index
    %c0_9 = arith.constant 0 : index
    %10 = vector.load %arg9[%c0_8, %c0_9] : memref<128x1xf32, #tpu.memory_space<vmem>>, vector<128x1xf32>
    %cst_10 = arith.constant dense<0.000000e+00> : vector<128xf32>
    %11 = vector.multi_reduction <add>, %4, %cst_10 [1] : vector<128x128xf32> to vector<128xf32>
    %12 = vector.shape_cast %11 : vector<128xf32> to vector<128x1xf32>
    %13 = arith.addf %10, %12 : vector<128x1xf32>
    %c0_11 = arith.constant 0 : index
    %c0_12 = arith.constant 0 : index
    %14 = vector.load %arg9[%c0_11, %c0_12] : memref<128x1xf32, #tpu.memory_space<vmem>>, vector<128x1xf32>
    tpu.vector_store %arg9[%c0_11, %c0_12], %13 {strides = array<i32>} : memref<128x1xf32, #tpu.memory_space<vmem>>, vector<128x1xf32>,
    %c0_i32_13 = arith.constant 0 : i32
    %15 = arith.cmpi eq, %arg1, %c0_i32_13 : i32
    %16 = arith.extui %15 : i1 to i32
    %c0_i32_14 = arith.constant 0 : i32
    %17 = arith.cmpi ne, %16, %c0_i32_14 : i32
    scf.if %17 {
      %c0_15 = arith.constant 0 : index
      %c0_16 = arith.constant 0 : index
      %18 = vector.load %arg9[%c0_15, %c0_16] : memref<128x1xf32, #tpu.memory_space<vmem>>, vector<128x1xf32>
      %cst_17 = arith.constant 1.000000e+00 : f32
      %19 = vector.broadcast %cst_17 : f32 to vector<128x1xf32>
      %20 = arith.maximumf %18, %19 : vector<128x1xf32>
      %cst_18 = arith.constant 1.000000e+00 : f32
      %21 = vector.broadcast %cst_18 : f32 to vector<128x1xf32>
      %22 = arith.divf %21, %20 : vector<128x1xf32>
      %c0_19 = arith.constant 0 : index
      %c0_20 = arith.constant 0 : index
      %23 = vector.load %arg8[%c0_19, %c0_20] : memref<128x128xf32, #tpu.memory_space<vmem>>, vector<128x128xf32>
      %24 = vector.broadcast %22 : vector<128x1xf32> to vector<128x128xf32>
      %25 = arith.mulf %23, %24 : vector<128x128xf32>
      %c0_21 = arith.constant 0 : index
      %c0_22 = arith.constant 0 : index
      %26 = vector.load %arg4[%c0_21, %c0_22] : memref<128x128xf32, #tpu.memory_space<vmem>>, vector<128x128xf32>
      %c0_23 = arith.constant 0 : index
      %c0_24 = arith.constant 0 : index
      %27 = vector.load %arg10[%c0_23, %c0_24] : memref<128x256xf32, #tpu.memory_space<vmem>>, vector<128x128xf32>
      tpu.vector_store %arg10[%c0_23, %c0_24], %26 {strides = array<i32>} : memref<128x256xf32, #tpu.memory_space<vmem>>, vector<128x128xf32>,
      %c0_25 = arith.constant 0 : index
      %c128 = arith.constant 128 : index
      %28 = vector.load %arg10[%c0_25, %c128] : memref<128x256xf32, #tpu.memory_space<vmem>>, vector<128x128xf32>
      tpu.vector_store %arg10[%c0_25, %c128], %25 {strides = array<i32>} : memref<128x256xf32, #tpu.memory_space<vmem>>, vector<128x128xf32>,
      %c0_26 = arith.constant 0 : index
      %c0_27 = arith.constant 0 : index
      %29 = vector.load %arg10[%c0_26, %c0_27] : memref<128x256xf32, #tpu.memory_space<vmem>>, vector<128x256xf32>
      %c0_28 = arith.constant 0 : index
      %c0_29 = arith.constant 0 : index
      %30 = vector.load %arg5[%c0_28, %c0_29] : memref<256x128xf32, #tpu.memory_space<vmem>>, vector<256x128xf32>
      %cst_30 = arith.constant dense<0.000000e+00> : vector<128x128xf32>
      %31 = tpu.matmul %29, %30, %cst_30 {dimension_numbers = #tpu.dot_dimension_numbers<[1], [0], [0], [1], [0, 0, 1, 1], [], []>} : vector<128x256xf32>, vector<256x128xf32>, vector<128x128xf32> -> vector<128x128xf32>
      %c0_31 = arith.constant 0 : index
      %c0_32 = arith.constant 0 : index
      %32 = vector.load %arg6[%c0_31, %c0_32] : memref<1x128xf32, #tpu.memory_space<vmem>>, vector<1x128xf32>
      %33 = vector.broadcast %32 : vector<1x128xf32> to vector<128x128xf32>
      %34 = arith.addf %31, %33 : vector<128x128xf32>
      %cst_33 = arith.constant 0.000000e+00 : f32
      %35 = vector.broadcast %cst_33 : f32 to vector<128x128xf32>
      %36 = arith.cmpf ogt, %34, %35 : vector<128x128xf32>
      %cst_34 = arith.constant 0.00999999977 : f32
      %37 = vector.broadcast %cst_34 : f32 to vector<128x128xf32>
      %38 = arith.mulf %37, %34 : vector<128x128xf32>
      %39 = arith.select %36, %34, %38 : vector<128x128xi1>, vector<128x128xf32>
      %c0_35 = arith.constant 0 : index
      %c0_36 = arith.constant 0 : index
      %40 = vector.load %arg7[%c0_35, %c0_36] : memref<128x128xf32, #tpu.memory_space<vmem>>, vector<128x128xf32>
      tpu.vector_store %arg7[%c0_35, %c0_36], %39 {strides = array<i32>} : memref<128x128xf32, #tpu.memory_space<vmem>>, vector<128x128xf32>,
    } else {
    }
    return
  }
  func.func @transform_0(%arg0: i32, %arg1: i32) -> (i32, i32) {
    %c0_i32 = arith.constant 0 : i32
    return %arg0, %arg1 : i32, i32
  }
  func.func @transform_1(%arg0: i32, %arg1: i32) -> (i32, i32) {
    %c0_i32 = arith.constant 0 : i32
    %c0_i32_0 = arith.constant 0 : i32
    return %arg1, %c0_i32 : i32, i32
  }
  func.func @transform_2(%arg0: i32, %arg1: i32) -> (i32, i32) {
    %c0_i32 = arith.constant 0 : i32
    %c0_i32_0 = arith.constant 0 : i32
    return %arg0, %c0_i32 : i32, i32
  }
  func.func @transform_3(%arg0: i32, %arg1: i32) -> (i32, i32) {
    %c0_i32 = arith.constant 0 : i32
    %c0_i32_0 = arith.constant 0 : i32
    %c0_i32_1 = arith.constant 0 : i32
    return %c0_i32, %c0_i32_0 : i32, i32
  }
  func.func @transform_4(%arg0: i32, %arg1: i32) -> (i32, i32) {
    %c0_i32 = arith.constant 0 : i32
    %c0_i32_0 = arith.constant 0 : i32
    %c0_i32_1 = arith.constant 0 : i32
    return %c0_i32, %c0_i32_0 : i32, i32
  }
  func.func @transform_5(%arg0: i32, %arg1: i32) -> (i32, i32) {
    %c0_i32 = arith.constant 0 : i32
    %c0_i32_0 = arith.constant 0 : i32
    return %arg0, %c0_i32 : i32, i32
  }
}

module attributes {stable_mosaic.version = 11 : i64} {
  func.func @_pool_readout_kernel(%arg0: i32, %arg1: memref<128x128xf32, #tpu.memory_space<vmem>>, %arg2: memref<128x128xf32, #tpu.memory_space<vmem>>, %arg3: memref<1x128xf32, #tpu.memory_space<vmem>>, %arg4: memref<1x128xf32, #tpu.memory_space<vmem>>, %arg5: memref<1x128xf32, #tpu.memory_space<vmem>>) attributes {dimension_semantics = [#tpu.dimension_semantics<arbitrary>], iteration_bounds = array<i64: 1>, scalar_prefetch = 0 : i64, scratch_operands = 1 : i64, tpu.core_type = #tpu.core_type<tc>, window_params = [{transform_indices = @transform_0, window_bounds = array<i64: 128, 128>}, {pipeline_mode = #tpu.pipeline_mode<synchronous>, transform_indices = @transform_1, window_bounds = array<i64: 128, 128>}, {pipeline_mode = #tpu.pipeline_mode<synchronous>, transform_indices = @transform_2, window_bounds = array<i64: 1, 128>}, {pipeline_mode = #tpu.pipeline_mode<synchronous>, transform_indices = @transform_3, window_bounds = array<i64: 1, 128>}]} {
    %c0_i32 = arith.constant 0 : i32
    %0 = arith.cmpi eq, %arg0, %c0_i32 : i32
    %1 = arith.extui %0 : i1 to i32
    %c0_i32_0 = arith.constant 0 : i32
    %2 = arith.cmpi ne, %1, %c0_i32_0 : i32
    scf.if %2 {
      %cst_9 = arith.constant 0.000000e+00 : f32
      %20 = vector.broadcast %cst_9 : f32 to vector<1x128xf32>
      %c0_10 = arith.constant 0 : index
      %c0_11 = arith.constant 0 : index
      %21 = vector.load %arg5[%c0_10, %c0_11] : memref<1x128xf32, #tpu.memory_space<vmem>>, vector<1x128xf32>
      tpu.vector_store %arg5[%c0_10, %c0_11], %20 {strides = array<i32>} : memref<1x128xf32, #tpu.memory_space<vmem>>, vector<1x128xf32>,
    } else {
    }
    %3 = tpu.iota {dimensions = array<i32: 0>} : vector<128x128xi32>
    %c128_i32 = arith.constant 128 : i32
    %4 = arith.muli %arg0, %c128_i32 : i32
    %5 = vector.broadcast %4 : i32 to vector<128x128xi32>
    %6 = arith.addi %3, %5 : vector<128x128xi32>
    %c16_i32 = arith.constant 16 : i32
    %7 = vector.broadcast %c16_i32 : i32 to vector<128x128xi32>
    %8 = arith.cmpi slt, %6, %7 : vector<128x128xi32>
    %c0 = arith.constant 0 : index
    %c0_1 = arith.constant 0 : index
    %9 = vector.load %arg1[%c0, %c0_1] : memref<128x128xf32, #tpu.memory_space<vmem>>, vector<128x128xf32>
    %cst = arith.constant 0.000000e+00 : f32
    %10 = vector.broadcast %cst : f32 to vector<128x128xf32>
    %11 = arith.select %8, %9, %10 : vector<128x128xi1>, vector<128x128xf32>
    %c0_2 = arith.constant 0 : index
    %c0_3 = arith.constant 0 : index
    %12 = vector.load %arg5[%c0_2, %c0_3] : memref<1x128xf32, #tpu.memory_space<vmem>>, vector<1x128xf32>
    %cst_4 = arith.constant dense<0.000000e+00> : vector<128xf32>
    %13 = vector.multi_reduction <add>, %11, %cst_4 [0] : vector<128x128xf32> to vector<128xf32>
    %14 = vector.shape_cast %13 : vector<128xf32> to vector<1x128xf32>
    %15 = arith.addf %12, %14 : vector<1x128xf32>
    %c0_5 = arith.constant 0 : index
    %c0_6 = arith.constant 0 : index
    %16 = vector.load %arg5[%c0_5, %c0_6] : memref<1x128xf32, #tpu.memory_space<vmem>>, vector<1x128xf32>
    tpu.vector_store %arg5[%c0_5, %c0_6], %15 {strides = array<i32>} : memref<1x128xf32, #tpu.memory_space<vmem>>, vector<1x128xf32>,
    %c0_i32_7 = arith.constant 0 : i32
    %17 = arith.cmpi eq, %arg0, %c0_i32_7 : i32
    %18 = arith.extui %17 : i1 to i32
    %c0_i32_8 = arith.constant 0 : i32
    %19 = arith.cmpi ne, %18, %c0_i32_8 : i32
    scf.if %19 {
      %c0_9 = arith.constant 0 : index
      %c0_10 = arith.constant 0 : index
      %20 = vector.load %arg5[%c0_9, %c0_10] : memref<1x128xf32, #tpu.memory_space<vmem>>, vector<1x128xf32>
      %cst_11 = arith.constant 6.250000e-02 : f32
      %21 = vector.broadcast %cst_11 : f32 to vector<1x128xf32>
      %22 = arith.mulf %20, %21 : vector<1x128xf32>
      %c0_12 = arith.constant 0 : index
      %c0_13 = arith.constant 0 : index
      %23 = vector.load %arg2[%c0_12, %c0_13] : memref<128x128xf32, #tpu.memory_space<vmem>>, vector<128x128xf32>
      %cst_14 = arith.constant dense<0.000000e+00> : vector<1x128xf32>
      %24 = tpu.matmul %22, %23, %cst_14 {dimension_numbers = #tpu.dot_dimension_numbers<[1], [0], [0], [1], [0, 0, 1, 1], [], []>} : vector<1x128xf32>, vector<128x128xf32>, vector<1x128xf32> -> vector<1x128xf32>
      %c0_15 = arith.constant 0 : index
      %c0_16 = arith.constant 0 : index
      %25 = vector.load %arg3[%c0_15, %c0_16] : memref<1x128xf32, #tpu.memory_space<vmem>>, vector<1x128xf32>
      %26 = arith.addf %24, %25 : vector<1x128xf32>
      %27 = arith.negf %26 : vector<1x128xf32>
      %28 = math.exp %27 : vector<1x128xf32>
      %cst_17 = arith.constant 1.000000e+00 : f32
      %29 = vector.broadcast %cst_17 : f32 to vector<1x128xf32>
      %30 = arith.addf %29, %28 : vector<1x128xf32>
      %31 = arith.divf %29, %30 : vector<1x128xf32>
      %c0_18 = arith.constant 0 : index
      %c0_19 = arith.constant 0 : index
      %32 = vector.load %arg4[%c0_18, %c0_19] : memref<1x128xf32, #tpu.memory_space<vmem>>, vector<1x128xf32>
      tpu.vector_store %arg4[%c0_18, %c0_19], %31 {strides = array<i32>} : memref<1x128xf32, #tpu.memory_space<vmem>>, vector<1x128xf32>,
    } else {
    }
    return
  }
  func.func @transform_0(%arg0: i32) -> (i32, i32) {
    %c0_i32 = arith.constant 0 : i32
    %c0_i32_0 = arith.constant 0 : i32
    return %arg0, %c0_i32 : i32, i32
  }
  func.func @transform_1(%arg0: i32) -> (i32, i32) {
    %c0_i32 = arith.constant 0 : i32
    %c0_i32_0 = arith.constant 0 : i32
    %c0_i32_1 = arith.constant 0 : i32
    return %c0_i32, %c0_i32_0 : i32, i32
  }
  func.func @transform_2(%arg0: i32) -> (i32, i32) {
    %c0_i32 = arith.constant 0 : i32
    %c0_i32_0 = arith.constant 0 : i32
    %c0_i32_1 = arith.constant 0 : i32
    return %c0_i32, %c0_i32_0 : i32, i32
  }
  func.func @transform_3(%arg0: i32) -> (i32, i32) {
    %c0_i32 = arith.constant 0 : i32
    %c0_i32_0 = arith.constant 0 : i32
    %c0_i32_1 = arith.constant 0 : i32
    return %c0_i32, %c0_i32_0 : i32, i32
  }
}

</mosaic_0001>

<bundles_post_ra>
// kernel: mlpgnn_two_forward.4
= control target key start
LH: loop header
LB: loop body
LE: loop exit
PB: predicated region body
PF: predicated region fallthrough
CT: control target
= control target key end

     0   :  { %s503_s1 = inlined_call_operand.vmem [shape: f32[128,128], index: 1, kind: input, shape index: {}]   ;;  %s504_s0 = inlined_call_operand.vmem [shape: f32[128,128], index: 0, kind: input, shape index: {}]   ;;  %s505_s2 = inlined_call_operand.vmem [shape: f32[128,128], index: 2, kind: output, shape index: {}]  }
   0x1   :  { %v27_v0 = vld [vmem:[%s503_s1] sm:$0xff]  ;;  %v28_v1 = vld [vmem:[%s503_s1 + $0x8] sm:$0xff]  ;;  %v29_v2 = vld [vmem:[%s503_s1 + $0x10] sm:$0xff] }
   0x2   :  { %v296_v3 = vpack.c.bf16 %v28_v1, %v27_v0  ;;  %v30_v4 = vld [vmem:[%s503_s1 + $0x18] sm:$0xff]  ;;  %v31_v6 = vld [vmem:[%s503_s1 + $0x20] sm:$0xff]  ;;  %v32_v7 = vld [vmem:[%s503_s1 + $0x28] sm:$0xff] }
   0x3   :  { %v300_v5 = vpack.c.bf16 %v30_v4, %v29_v2  ;;  %v304_v8 = vpack.c.bf16 %v32_v7, %v31_v6  ;;  %v11_v9 = vld [vmem:[%s504_s0] sm:$0xff]  ;;  %v33_v11 = vld [vmem:[%s503_s1 + $0x30] sm:$0xff]  ;;  %v34_v12 = vld [vmem:[%s503_s1 + $0x38] sm:$0xff] }
   0x4   :  { %297 = vmatprep.subr.bf16.mxu0 %v296_v3  ;;  %328 = vmatprep.subr.bf16.mxu1 %v296_v3  ;;  %v19_v10 = vld [vmem:[%s504_s0 + $0x40] sm:$0xff]  ;;  %v308_v13 = vpack.c.bf16 %v34_v12, %v33_v11  ;;  %v36_v15 = vld [vmem:[%s503_s1 + $0x48] sm:$0xff]  ;;  %v37_v17 = vld [vmem:[%s503_s1 + $0x50] sm:$0xff] }
   0x5   :  { %299 = vmatpush3.bf16.msra.mxu0 %v296_v3  ;;  %336 = vmatpush3.bf16.msra.mxu1 %v296_v3  ;;  %v35_v14 = vld [vmem:[%s503_s1 + $0x40] sm:$0xff]  ;;  %v38_v18 = vld [vmem:[%s503_s1 + $0x58] sm:$0xff]  ;;  %v40_v21 = vld [vmem:[%s503_s1 + $0x68] sm:$0xff] }
   0x6   :  { %301 = vmatprep.subr.bf16.mxu0 %v300_v5  ;;  %329 = vmatprep.subr.bf16.mxu1 %v300_v5  ;;  %v312_v16 = vpack.c.bf16 %v36_v15, %v35_v14  ;;  %v316_v19 = vpack.c.bf16 %v38_v18, %v37_v17  ;;  %v39_v20 = vld [vmem:[%s503_s1 + $0x60] sm:$0xff]  ;;  %v41_v23 = vld [vmem:[%s503_s1 + $0x70] sm:$0xff]  ;;  %v42_v24 = vld [vmem:[%s503_s1 + $0x78] sm:$0xff] }
   0x7   :  { %272 = vmatprep.mubr.f32.mxu0 %v11_v9  ;;  %284 = vmatprep.mubr.f32.mxu1 %v19_v10  ;;  %v320_v22 = vpack.c.bf16 %v40_v21, %v39_v20  ;;  %v324_v25 = vpack.c.bf16 %v42_v24, %v41_v23  ;;  %v12_v26 = vld [vmem:[%s504_s0 + $0x8] sm:$0xff]  ;;  %v13_v28 = vld [vmem:[%s504_s0 + $0x10] sm:$0xff]  ;;  %v14_v30 = vld [vmem:[%s504_s0 + $0x18] sm:$0xff] }
   0x8   :  { %v20_v27 = vld [vmem:[%s504_s0 + $0x48] sm:$0xff]  ;;  %v21_v29 = vld [vmem:[%s504_s0 + $0x50] sm:$0xff]  ;;  %v22_v31 = vld [vmem:[%s504_s0 + $0x58] sm:$0xff] }
   0x9   :  { %303 = vmatpush3.bf16.msra.mxu0 %v300_v5  ;;  %337 = vmatpush3.bf16.msra.mxu1 %v300_v5  ;;  %v15_v32 = vld [vmem:[%s504_s0 + $0x20] sm:$0xff]  ;;  %v16_v34 = vld [vmem:[%s504_s0 + $0x28] sm:$0xff]  ;;  %v17_v36 = vld [vmem:[%s504_s0 + $0x30] sm:$0xff] }
   0xa   :  { %305 = vmatprep.subr.bf16.mxu0 %v304_v8  ;;  %330 = vmatprep.subr.bf16.mxu1 %v304_v8  ;;  %v23_v33 = vld [vmem:[%s504_s0 + $0x60] sm:$0xff]  ;;  %v24_v35 = vld [vmem:[%s504_s0 + $0x68] sm:$0xff]  ;;  %v25_v37 = vld [vmem:[%s504_s0 + $0x70] sm:$0xff] }
   0xb   :  { %v18_v38 = vld [vmem:[%s504_s0 + $0x38] sm:$0xff] }
   0xc   :  { %v26_v39 = vld [vmem:[%s504_s0 + $0x78] sm:$0xff] }
   0xd   :  { %307 = vmatpush3.bf16.msra.mxu0 %v304_v8  ;;  %338 = vmatpush3.bf16.msra.mxu1 %v304_v8 }
   0xe   :  { %309 = vmatprep.subr.bf16.mxu0 %v308_v13  ;;  %331 = vmatprep.subr.bf16.mxu1 %v308_v13 }
  0x11   :  { %311 = vmatpush3.bf16.msra.mxu0 %v308_v13  ;;  %339 = vmatpush3.bf16.msra.mxu1 %v308_v13 }
  0x12   :  { %313 = vmatprep.subr.bf16.mxu0 %v312_v16  ;;  %332 = vmatprep.subr.bf16.mxu1 %v312_v16 }
  0x15   :  { %315 = vmatpush3.bf16.msra.mxu0 %v312_v16  ;;  %340 = vmatpush3.bf16.msra.mxu1 %v312_v16 }
  0x16   :  { %317 = vmatprep.subr.bf16.mxu0 %v316_v19  ;;  %333 = vmatprep.subr.bf16.mxu1 %v316_v19 }
  0x19   :  { %319 = vmatpush3.bf16.msra.mxu0 %v316_v19  ;;  %341 = vmatpush3.bf16.msra.mxu1 %v316_v19 }
  0x1a   :  { %321 = vmatprep.subr.bf16.mxu0 %v320_v22  ;;  %334 = vmatprep.subr.bf16.mxu1 %v320_v22 }
  0x1d   :  { %323 = vmatpush3.bf16.msra.mxu0 %v320_v22  ;;  %342 = vmatpush3.bf16.msra.mxu1 %v320_v22 }
  0x1e   :  { %325 = vmatprep.subr.bf16.mxu0 %v324_v25  ;;  %335 = vmatprep.subr.bf16.mxu1 %v324_v25 }
  0x21   :  { %327 = vmatpush3.bf16.msra.mxu0 %v324_v25  ;;  %343 = vmatpush3.bf16.msra.mxu1 %v324_v25 }
  0x24   :  { %273 = vmatmul.mubr.f32.vlgmr.msra.gmra.mrb[0].mxu0 %v12_v26  ;;  %285 = vmatmul.mubr.f32.vlgmr.msra.gmra.mrb[0].mxu1 %v20_v27 }
  0x25   :  { %275 = vmatprep.mubr.f32.mxu0 %v13_v28  ;;  %287 = vmatprep.mubr.f32.mxu1 %v21_v29 }
  0x28   :  { %276 = vmatmul.mubr.f32.gmra.mrb[2].mxu0 %v14_v30  ;;  %288 = vmatmul.mubr.f32.gmra.mrb[2].mxu1 %v22_v31 }
  0x29   :  { %278 = vmatprep.mubr.f32.mxu0 %v15_v32  ;;  %290 = vmatprep.mubr.f32.mxu1 %v23_v33 }
  0x2c   :  { %279 = vmatmul.mubr.f32.gmra.mrb[4].mxu0 %v16_v34  ;;  %291 = vmatmul.mubr.f32.gmra.mrb[4].mxu1 %v24_v35 }
  0x2d   :  { %281 = vmatprep.mubr.f32.mxu0 %v17_v36  ;;  %293 = vmatprep.mubr.f32.mxu1 %v25_v37 }
  0x30   :  { %282 = vmatmul.mubr.f32.gmra.mrb[6].mxu0 %v18_v38  ;;  %294 = vmatmul.mubr.f32.gmra.mrb[6].mxu1 %v26_v39 }
  0xf7   :  { %v274_v40 = vpop.f32.mrb[0].mxu0  ;;  %v286_v41 = vpop.f32.mrb[0].mxu1 }
  0xf8   :  { %189 = vst [vmem:[%s505_s2 + $0x8] sm:$0xff] %v274_v40  ;;  %197 = vst [vmem:[%s505_s2 + $0x48] sm:$0xff] %v286_v41  ;;  %v109_v42 = vpop.f32.mrb[1].mxu0  ;;  %v149_v43 = vpop.f32.mrb[1].mxu1 }
  0xf9   :  { %188 = vst [vmem:[%s505_s2] sm:$0xff] %v109_v42  ;;  %196 = vst [vmem:[%s505_s2 + $0x40] sm:$0xff] %v149_v43 }
  0xfb   :  { %v277_v44 = vpop.f32.mrb[2].mxu0  ;;  %v289_v45 = vpop.f32.mrb[2].mxu1 }
  0xfc   :  { %191 = vst [vmem:[%s505_s2 + $0x18] sm:$0xff] %v277_v44  ;;  %199 = vst [vmem:[%s505_s2 + $0x58] sm:$0xff] %v289_v45  ;;  %v119_v46 = vpop.f32.mrb[3].mxu0  ;;  %v159_v47 = vpop.f32.mrb[3].mxu1 }
  0xfd   :  { %190 = vst [vmem:[%s505_s2 + $0x10] sm:$0xff] %v119_v46  ;;  %198 = vst [vmem:[%s505_s2 + $0x50] sm:$0xff] %v159_v47 }
  0xff   :  { %v280_v48 = vpop.f32.mrb[4].mxu0  ;;  %v292_v49 = vpop.f32.mrb[4].mxu1 }
 0x100   :  { %193 = vst [vmem:[%s505_s2 + $0x28] sm:$0xff] %v280_v48  ;;  %201 = vst [vmem:[%s505_s2 + $0x68] sm:$0xff] %v292_v49  ;;  %v129_v50 = vpop.f32.mrb[5].mxu0  ;;  %v169_v51 = vpop.f32.mrb[5].mxu1 }
 0x101   :  { %192 = vst [vmem:[%s505_s2 + $0x20] sm:$0xff] %v129_v50  ;;  %200 = vst [vmem:[%s505_s2 + $0x60] sm:$0xff] %v169_v51 }
 0x103   :  { %v283_v52 = vpop.f32.mrb[6].mxu0  ;;  %v295_v53 = vpop.f32.mrb[6].mxu1 }
 0x104   :  { %195 = vst [vmem:[%s505_s2 + $0x38] sm:$0xff] %v283_v52  ;;  %203 = vst [vmem:[%s505_s2 + $0x78] sm:$0xff] %v295_v53  ;;  %v139_v54 = vpop.f32.mrb[7].mxu0  ;;  %v179_v55 = vpop.f32.mrb[7].mxu1 }
 0x105   :  { %194 = vst [vmem:[%s505_s2 + $0x30] sm:$0xff] %v139_v54  ;;  %202 = vst [vmem:[%s505_s2 + $0x70] sm:$0xff] %v179_v55 }

// kernel: mlpgnn_two_forward.7
= control target key start
LH: loop header
LB: loop body
LE: loop exit
PB: predicated region body
PF: predicated region fallthrough
CT: control target
= control target key end

     0   :  { %v349_v3 = vmov 0.0|0.0   ;;  %v350_v6 = vmov 0.0   ;;  %vm351_vm0 = vmmov 0   ;;  %s442_s0 = inlined_call_operand.vmem [shape: f32[128,128], index: 0, kind: input, shape index: {}]   ;;  %s443_s1 = inlined_call_operand.vmem [shape: f32[128,128], index: 1, kind: input, shape index: {}]   ;;  %s444_s2 = inlined_call_operand.vmem [shape: f32[1,128], index: 2, kind: input, shape index: {}]   ;;  %s445_s3 = inlined_call_operand.hbm [shape: f32[1,128], index: 3, kind: output, shape index: {}]  }
   0x1   :  { %v132_v0 = vld [vmem:[%s443_s1] sm:$0xff]  ;;  %v133_v1 = vld [vmem:[%s443_s1 + $0x8] sm:$0xff]  ;;  %v134_v2 = vld [vmem:[%s443_s1 + $0x10] sm:$0xff]  ;;  %293 = vmatprep.subr.bf16.mxu0 %v349_v3  ;;  %19 = vst [vmem:[#allocation2] sm:$0x1] %v350_v6  ;;  %290 = vmatprep.mubr.msk.f32.mxu0 %vm351_vm0, %v350_v6 }
   0x2   :  { %v294_v4 = vpack.c.bf16 %v133_v1, %v132_v0  ;;  %v135_v5 = vld [vmem:[%s443_s1 + $0x18] sm:$0xff]  ;;  %v136_v8 = vld [vmem:[%s443_s1 + $0x20] sm:$0xff]  ;;  %v137_v9 = vld [vmem:[%s443_s1 + $0x28] sm:$0xff] }
   0x3   :  { %v297_v7 = vpack.c.bf16 %v135_v5, %v134_v2  ;;  %v71_v10 = vld [vmem:[%s442_s0] sm:$0xff]  ;;  %v72_v11 = vld [vmem:[%s442_s0 + $0x8] sm:$0xff] }
   0x4   :  { %295 = vmatpush3.bf16.msra.mxu0 %v294_v4  ;;  %v104_v12 = vadd.f32 %v72_v11, %v71_v10 }
   0x5   :  { %296 = vmatprep.subr.bf16.mxu0 %v349_v3 }
   0x6   :  { %8 = vsyncpa [#allocation4], 0  ;;  %v300_v13 = vpack.c.bf16 %v137_v9, %v136_v8  ;;  %v138_v14 = vld [vmem:[%s443_s1 + $0x30] sm:$0xff]  ;;  %v139_v15 = vld [vmem:[%s443_s1 + $0x38] sm:$0xff]  ;;  %v119_v16 = vrot.slane %v104_v12, 4 }
   0x7   :  { %v303_v18 = vpack.c.bf16 %v139_v15, %v138_v14  ;;  %v140_v19 = vld [vmem:[%s443_s1 + $0x40] sm:$0xff]  ;;  %v141_v20 = vld [vmem:[%s443_s1 + $0x48] sm:$0xff]  ;;  %v142_v24 = vld [vmem:[%s443_s1 + $0x50] sm:$0xff] }
   0x8   :  { %298 = vmatpush3.bf16.msra.mxu0 %v297_v7  ;;  %v120_v17 = vadd.f32 %v119_v16, %v104_v12  ;;  %v306_v23 = vpack.c.bf16 %v141_v20, %v140_v19  ;;  %v143_v25 = vld [vmem:[%s443_s1 + $0x58] sm:$0xff]  ;;  %v103_v27 = vld [vmem:[#allocation2] sm:$0x1]  ;;  %v145_v31 = vld [vmem:[%s443_s1 + $0x68] sm:$0xff] }
   0x9   :  { %299 = vmatprep.subr.bf16.mxu0 %v349_v3  ;;  %v309_v29 = vpack.c.bf16 %v143_v25, %v142_v24  ;;  %v144_v30 = vld [vmem:[%s443_s1 + $0x60] sm:$0xff]  ;;  %v146_v34 = vld [vmem:[%s443_s1 + $0x70] sm:$0xff]  ;;  %v147_v35 = vld [vmem:[%s443_s1 + $0x78] sm:$0xff]  ;;  %s352_s1 = smov [#allocation3]  }
   0xa   :  { %v121_v21 = vrot.slane %v120_v17, 2  ;;  %v312_v33 = vpack.c.bf16 %v145_v31, %v144_v30  ;;  %v315_v36 = vpack.c.bf16 %v147_v35, %v146_v34  ;;  %v148_v39 = vld [vmem:[%s444_s2] sm:$0x1]  ;;  %s232_s22 = sshll.u32 %s352_s1, 4  ;;  %s233_s22 = int_to_ptr.vmem [resolvable:$true] %s232_s22 }
   0xb   :  { %s325_s23 = scalar_lea.vmem %s233_s22, 16  ;;  %s329_s24 = scalar_lea.vmem %s233_s22, 32 }
   0xc   :  { %301 = vmatpush3.bf16.msra.mxu0 %v300_v13  ;;  %v122_v22 = vadd.f32 %v121_v21, %v120_v17  ;;  %p326_p0 = scmp.ne.s32.totalorder %s233_s22, %s325_s23  ;;  %p330_p1 = scmp.lt.s32.totalorder %s233_s22, %s233_s22 }
   0xd   :  { %302 = vmatprep.subr.bf16.mxu0 %v349_v3  ;;  %p331_p2 = scmp.lt.s32.totalorder %s329_s24, %s325_s23 }
   0xe   :  { %v123_v26 = vrot.slane %v122_v22, 1 }
   0xf   :  { %p332_p3 = por %p331_p2, %p330_p1 }
  0x10   :  { %304 = vmatpush3.bf16.msra.mxu0 %v303_v18  ;;  %v124_v28 = vadd.f32 %v123_v26, %v122_v22 }
  0x11   :  { %305 = vmatprep.subr.bf16.mxu0 %v349_v3  ;;  %p333_p4 = pnand %p332_p3, %p326_p0 }
  0x12   :  { %v125_v32 = vadd.f32 %v124_v28, %v103_v27 }
  0x14   :  { %307 = vmatpush3.bf16.msra.mxu0 %v306_v23  ;;  %126 = vst [vmem:[#allocation2] sm:$0x1] %v125_v32 }
  0x15   :  { %308 = vmatprep.subr.bf16.mxu0 %v349_v3 }
  0x18   :  { %310 = vmatpush3.bf16.msra.mxu0 %v309_v29 }
  0x19   :  { %311 = vmatprep.subr.bf16.mxu0 %v349_v3 }
  0x1b   :  { %v130_v37 = vld [vmem:[#allocation2] sm:$0x1] }
  0x1c   :  { %313 = vmatpush3.bf16.msra.mxu0 %v312_v33  ;;  %v131_v38 = vmul.f32 0.0625, %v130_v37 }
  0x1d   :  { %314 = vmatprep.subr.bf16.mxu0 %v349_v3 }
  0x20   :  { %316 = vmatpush3.bf16.msra.mxu0 %v315_v36 }
  0x23   :  { %291 = vmatmul.mubr.f32.vlgmr.msra.gmra.mrb[0].mxu0 %v131_v38 }
  0xf6   :  { %v215_v40 = vpop.f32.mrb[0].mxu0 }
  0xf7   :  { %v216_v41 = vadd.f32 %v215_v40, %v148_v39  ;;  %v292_v42 = vpop.f32.mrb[1].mxu0 }
  0xf9   :  { %v240_v43 = vmul.f32 -1.442695, %v216_v41 }
  0xfb   :  { %321 = vpow2.f32 %v240_v43 }
 0x105   :  { %v322_v44 = vpop.eup %321 }
 0x106   :  { %v222_v45 = vadd.f32 1.0, %v322_v44 }
 0x108   :  { %323 = vrcp.f32 %v222_v45 }
 0x112   :  { %v324_v46 = vpop.eup %323 }
 0x113   :  { %225 = vst [vmem:[#allocation3] sm:$0x1] %v324_v46 }
 0x114   :  { %336 = shalt.err (!%p333_p4)
}
 0x115   :  { %s337_s26 = scalar_lea.hbm %s445_s3, 16 }
 0x116   :  { %p338_p5 = scmp.ne.s32.totalorder %s445_s3, %s337_s26  ;;  %p341_p6 = scmp.lt.u32.totalorder %s337_s26, %s445_s3 }
 0x118   :  { %p343_p7 = pnand %p341_p6, %p338_p5 }
 0x11a   :  { %346 = shalt.err (!%p343_p7)
}
 0x11b   :  { %235 = dma.vmem_to_hbm [thread:$0]  %s233_s22, 16, %s445_s3, [#allocation4]  }
 0x11c   :  { %347 = dma.done.wait [#allocation4], 16  }
 0x11d   :  { %348 = vsyncadd [#allocation4], 4294967280 }
 0x11e   :  { %239 = vsyncpa [#allocation4], 1 }

// kernel: mlpgnn_two_forward.5
= control target key start
LH: loop header
LB: loop body
LE: loop exit
PB: predicated region body
PF: predicated region fallthrough
CT: control target
= control target key end

     0   :  { %vm40_vm0 = vcmask 7168   ;;  %v1214_v2 = vmov 0.0   ;;  %v1215_v49 = vmov 0   ;;  %s1619_s0 = inlined_call_operand.vmem [shape: bf16[128,128], index: 0, kind: input, shape index: {}]   ;;  %s1620_s1 = inlined_call_operand.vmem [shape: f32[128,128], index: 1, kind: input, shape index: {}, may-alias: {1,2}]   ;;  %s1621_s3 = inlined_call_operand.vmem [shape: f32[256,128], index: 3, kind: input, shape index: {}]   ;;  %s1622_s2 = inlined_call_operand.vmem [shape: f32[128,128], index: 2, kind: input, shape index: {}, may-alias: {1,2}]   ;;  %s1623_s4 = inlined_call_operand.vmem [shape: f32[1,128], index: 4, kind: input, shape index: {}]   ;;  %s1624_s5 = inlined_call_operand.vmem [shape: f32[128,128], index: 5, kind: output, shape index: {}]  }
   0x1   :  { %v1249_v0 = vld [vmem:[%s1619_s0 + $0x18] sm:$0xff]   ;;  %v1254_v1 = vld [vmem:[%s1619_s0 + $0x10] sm:$0xff]   ;;  %47 = vst.msk [vmem:[#allocation3 + $0x30] sm:$0xff] %vm40_vm0, %v1214_v2  ;;  %41 = vst.msk [vmem:[#allocation3] sm:$0xff] %vm40_vm0, %v1214_v2  ;;  %1180 = vset.pattern.permute.xlu0 %v1215_v49  ;;  %1181 = vset.pattern.permute.xlu1 %v1215_v49 }
   0x2   :  { %42 = vst.msk [vmem:[#allocation3 + $0x8] sm:$0xff] %vm40_vm0, %v1214_v2  ;;  %43 = vst.msk [vmem:[#allocation3 + $0x10] sm:$0xff] %vm40_vm0, %v1214_v2  ;;  %v905_v3 = vunpack.c.l.bf16 %v1249_v0  ;;  %v901_v4 = vunpack.c.l.bf16 %v1254_v1  ;;  %v1277_v5 = vld [vmem:[%s1619_s0] sm:$0xff]   ;;  %v106_v7 = vld [vmem:[%s1620_s1 + $0x8] sm:$0xff]  ;;  %v906_v8 = vunpack.c.h.bf16 %v1249_v0  ;;  %v902_v9 = vunpack.c.h.bf16 %v1254_v1 }
   0x3   :  { %44 = vst.msk [vmem:[#allocation3 + $0x18] sm:$0xff] %vm40_vm0, %v1214_v2  ;;  %45 = vst.msk [vmem:[#allocation3 + $0x20] sm:$0xff] %vm40_vm0, %v1214_v2  ;;  %v105_v6 = vld [vmem:[%s1620_s1] sm:$0xff]  ;;  %v107_v10 = vld [vmem:[%s1620_s1 + $0x10] sm:$0xff]  ;;  %v893_v13 = vunpack.c.l.bf16 %v1277_v5  ;;  %v894_v35 = vunpack.c.h.bf16 %v1277_v5 }
   0x4   :  { %46 = vst.msk [vmem:[#allocation3 + $0x28] sm:$0xff] %vm40_vm0, %v1214_v2  ;;  %48 = vst.msk [vmem:[#allocation3 + $0x38] sm:$0xff] %vm40_vm0, %v1214_v2  ;;  %326 = vadd.xlane.f32.xlu1 %v905_v3  ;;  %322 = vadd.xlane.f32.xlu0 %v901_v4  ;;  %v108_v11 = vld [vmem:[%s1620_s1 + $0x18] sm:$0xff]  ;;  %v1300_v12 = vld [vmem:[%s1619_s0 + $0x20] sm:$0xff]   ;;  %v1098_v14 = vpack.c.bf16 %v106_v7, %v105_v6 }
   0x5   :  { %49 = vst.msk [vmem:[#allocation3 + $0x40] sm:$0xff] %vm40_vm0, %v1214_v2  ;;  %50 = vst.msk [vmem:[#allocation3 + $0x48] sm:$0xff] %vm40_vm0, %v1214_v2  ;;  %v1102_v15 = vpack.c.bf16 %v108_v11, %v107_v10  ;;  %v109_v16 = vld [vmem:[%s1620_s1 + $0x20] sm:$0xff]  ;;  %v110_v17 = vld [vmem:[%s1620_s1 + $0x28] sm:$0xff]  ;;  %1074 = vmatprep.mubr.f32.mxu0 %v893_v13  ;;  %v910_v18 = vunpack.c.h.bf16 %v1300_v12  ;;  %v909_v19 = vunpack.c.l.bf16 %v1300_v12 }
   0x6   :  { %51 = vst.msk [vmem:[#allocation3 + $0x50] sm:$0xff] %vm40_vm0, %v1214_v2  ;;  %52 = vst.msk [vmem:[#allocation3 + $0x58] sm:$0xff] %vm40_vm0, %v1214_v2  ;;  %1099 = vmatprep.subr.bf16.mxu0 %v1098_v14  ;;  %v1318_v20 = vld [vmem:[%s1619_s0 + $0x28] sm:$0xff]   ;;  %v1106_v21 = vpack.c.bf16 %v110_v17, %v109_v16  ;;  %v111_v22 = vld [vmem:[%s1620_s1 + $0x30] sm:$0xff] }
   0x7   :  { %53 = vst.msk [vmem:[#allocation3 + $0x60] sm:$0xff] %vm40_vm0, %v1214_v2  ;;  %54 = vst.msk [vmem:[#allocation3 + $0x68] sm:$0xff] %vm40_vm0, %v1214_v2  ;;  %1101 = vmatpush3.bf16.msra.mxu0 %v1098_v14  ;;  %v112_v23 = vld [vmem:[%s1620_s1 + $0x38] sm:$0xff]  ;;  %v914_v24 = vunpack.c.h.bf16 %v1318_v20  ;;  %v913_v25 = vunpack.c.l.bf16 %v1318_v20  ;;  %v928_v26 = vld [vmem:[%s1619_s0 + $0x30] sm:$0xff]  }
   0x8   :  { %55 = vst.msk [vmem:[#allocation3 + $0x70] sm:$0xff] %vm40_vm0, %v1214_v2  ;;  %56 = vst.msk [vmem:[#allocation3 + $0x78] sm:$0xff] %vm40_vm0, %v1214_v2  ;;  %328 = vadd.xlane.f32.xlu1 %v906_v8  ;;  %324 = vadd.xlane.f32.xlu0 %v902_v9  ;;  %v1110_v27 = vpack.c.bf16 %v112_v23, %v111_v22  ;;  %v113_v28 = vld [vmem:[%s1620_s1 + $0x40] sm:$0xff]  ;;  %v114_v29 = vld [vmem:[%s1620_s1 + $0x48] sm:$0xff]  ;;  %v917_v30 = vunpack.c.l.bf16 %v928_v26  ;;  %v918_v34 = vunpack.c.h.bf16 %v928_v26 }
   0x9   :  { %1103 = vmatprep.subr.bf16.mxu0 %v1102_v15  ;;  %v1114_v31 = vpack.c.bf16 %v114_v29, %v113_v28  ;;  %v115_v32 = vld [vmem:[%s1620_s1 + $0x50] sm:$0xff]  ;;  %v116_v33 = vld [vmem:[%s1620_s1 + $0x58] sm:$0xff]  ;;  %v923_v37 = vld [vmem:[%s1619_s0 + $0x8] sm:$0xff]  }
   0xa   :  { %v929_v36 = vld [vmem:[%s1619_s0 + $0x38] sm:$0xff]   ;;  %v1118_v38 = vpack.c.bf16 %v116_v33, %v115_v32  ;;  %v117_v39 = vld [vmem:[%s1620_s1 + $0x60] sm:$0xff]  ;;  %v118_v40 = vld [vmem:[%s1620_s1 + $0x68] sm:$0xff]  ;;  %v897_v42 = vunpack.c.l.bf16 %v923_v37  ;;  %v898_v47 = vunpack.c.h.bf16 %v923_v37 }
   0xb   :  { %1105 = vmatpush3.bf16.msra.mxu0 %v1102_v15  ;;  %v921_v41 = vunpack.c.l.bf16 %v929_v36  ;;  %v1122_v43 = vpack.c.bf16 %v118_v40, %v117_v39  ;;  %v119_v44 = vld [vmem:[%s1620_s1 + $0x70] sm:$0xff]  ;;  %v120_v45 = vld [vmem:[%s1620_s1 + $0x78] sm:$0xff]  ;;  %v922_v46 = vunpack.c.h.bf16 %v929_v36  ;;  %v654_v50 = vld [vmem:[%s1621_s3 + $0x80] sm:$0xff] }
   0xc   :  { %332 = vadd.xlane.f32.xlu1 %v910_v18  ;;  %330 = vadd.xlane.f32.xlu0 %v909_v19  ;;  %v1126_v48 = vpack.c.bf16 %v120_v45, %v119_v44  ;;  %v655_v51 = vld [vmem:[%s1621_s3 + $0x88] sm:$0xff]  ;;  %v638_v52 = vld [vmem:[%s1621_s3] sm:$0xff]  ;;  %v656_v55 = vld [vmem:[%s1621_s3 + $0x90] sm:$0xff] }
   0xd   :  { %1107 = vmatprep.subr.bf16.mxu0 %v1106_v21  ;;  %v1130_v53 = vpack.c.bf16 %v655_v51, %v654_v50  ;;  %v639_v54 = vld [vmem:[%s1621_s3 + $0x8] sm:$0xff]  ;;  %v657_v56 = vld [vmem:[%s1621_s3 + $0x98] sm:$0xff]  ;;  %v640_v59 = vld [vmem:[%s1621_s3 + $0x10] sm:$0xff] }
   0xe   :  { %v1132_v57 = vpack.c.bf16 %v639_v54, %v638_v52  ;;  %v1134_v58 = vpack.c.bf16 %v657_v56, %v656_v55  ;;  %v641_v60 = vld [vmem:[%s1621_s3 + $0x18] sm:$0xff]  ;;  %v658_v61 = vld [vmem:[%s1621_s3 + $0xa0] sm:$0xff]  ;;  %v659_v62 = vld [vmem:[%s1621_s3 + $0xa8] sm:$0xff] }
   0xf   :  { %1109 = vmatpush3.bf16.msra.mxu0 %v1106_v21  ;;  %1162 = vmatprep.subr.bf16.mxu1 %v1130_v53  ;;  %v1136_v63 = vpack.c.bf16 %v641_v60, %v640_v59  ;;  %v1138_v0 = vpack.c.bf16 %v659_v62, %v658_v61  ;;  %v642_v1 = vld [vmem:[%s1621_s3 + $0x20] sm:$0xff]  ;;  %v643_v2 = vld [vmem:[%s1621_s3 + $0x28] sm:$0xff]  ;;  %v644_v7 = vld [vmem:[%s1621_s3 + $0x30] sm:$0xff] }
  0x10   :  { %336 = vadd.xlane.f32.xlu1 %v914_v24  ;;  %334 = vadd.xlane.f32.xlu0 %v913_v25  ;;  %v1140_v5 = vpack.c.bf16 %v643_v2, %v642_v1  ;;  %v663_v10 = vld [vmem:[%s1621_s3 + $0xc8] sm:$0xff]  ;;  %v664_v16 = vld [vmem:[%s1621_s3 + $0xd0] sm:$0xff]  ;;  %v665_v17 = vld [vmem:[%s1621_s3 + $0xd8] sm:$0xff] }
  0x11   :  { %1111 = vmatprep.subr.bf16.mxu0 %v1110_v27  ;;  %1170 = vmatpush3.bf16.msra.mxu1 %v1132_v57  ;;  %v647_v14 = vld [vmem:[%s1621_s3 + $0x48] sm:$0xff]  ;;  %v649_v20 = vld [vmem:[%s1621_s3 + $0x58] sm:$0xff]  ;;  %v666_v22 = vld [vmem:[%s1621_s3 + $0xe0] sm:$0xff] }
  0x12   :  { %1163 = vmatprep.subr.bf16.mxu1 %v1134_v58  ;;  %v667_v23 = vld [vmem:[%s1621_s3 + $0xe8] sm:$0xff]  ;;  %v668_v28 = vld [vmem:[%s1621_s3 + $0xf0] sm:$0xff]  ;;  %v669_v29 = vld [vmem:[%s1621_s3 + $0xf8] sm:$0xff] }
  0x13   :  { %1113 = vmatpush3.bf16.msra.mxu0 %v1110_v27  ;;  %v651_v26 = vld [vmem:[%s1621_s3 + $0x68] sm:$0xff]  ;;  %v302_v32 = vld [vmem:[#allocation3 + $0x20] sm:$0xff]  ;;  %v305_v37 = vld [vmem:[#allocation3 + $0x38] sm:$0xff] }
  0x14   :  { %338 = vadd.xlane.f32.xlu1 %v917_v30  ;;  %314 = vadd.xlane.f32.xlu0 %v893_v13  ;;  %v646_v13 = vld [vmem:[%s1621_s3 + $0x40] sm:$0xff]  ;;  %v309_v49 = vld [vmem:[#allocation3 + $0x58] sm:$0xff]  ;;  %v308_v50 = vld [vmem:[#allocation3 + $0x50] sm:$0xff] }
  0x15   :  { %1115 = vmatprep.subr.bf16.mxu0 %v1114_v31  ;;  %1171 = vmatpush3.bf16.msra.mxu1 %v1136_v63  ;;  %v1148_v15 = vpack.c.bf16 %v647_v14, %v646_v13  ;;  %v306_v44 = vld [vmem:[#allocation3 + $0x40] sm:$0xff]  ;;  %v653_v13 = vld [vmem:[%s1621_s3 + $0x78] sm:$0xff]  ;;  %v312_v14 = vld [vmem:[#allocation3 + $0x70] sm:$0xff] }
  0x16   :  { %1164 = vmatprep.subr.bf16.mxu1 %v1138_v0  ;;  %v298_v60 = vld [vmem:[#allocation3] sm:$0xff] }
  0x17   :  { %1117 = vmatpush3.bf16.msra.mxu0 %v1114_v31  ;;  %v304_v31 = vld [vmem:[#allocation3 + $0x30] sm:$0xff] }
  0x18   :  { %340 = vadd.xlane.f32.xlu1 %v918_v34  ;;  %316 = vadd.xlane.f32.xlu0 %v894_v35 }
  0x19   :  { %1119 = vmatprep.subr.bf16.mxu0 %v1118_v38  ;;  %1172 = vmatpush3.bf16.msra.mxu1 %v1140_v5 }
  0x1b   :  { %1121 = vmatpush3.bf16.msra.mxu0 %v1118_v38  ;;  %v303_v38 = vld [vmem:[#allocation3 + $0x28] sm:$0xff] }
  0x1c   :  { %342 = vadd.xlane.f32.xlu1 %v921_v41  ;;  %318 = vadd.xlane.f32.xlu0 %v897_v42 }
  0x1d   :  { %1123 = vmatprep.subr.bf16.mxu0 %v1122_v43 }
  0x1f   :  { %1125 = vmatpush3.bf16.msra.mxu0 %v1122_v43  ;;  %v307_v43 = vld [vmem:[#allocation3 + $0x48] sm:$0xff] }
  0x20   :  { %344 = vadd.xlane.f32.xlu1 %v922_v46  ;;  %320 = vadd.xlane.f32.xlu0 %v898_v47 }
  0x21   :  { %1127 = vmatprep.subr.bf16.mxu0 %v1126_v48 }
  0x23   :  { %1129 = vmatpush3.bf16.msra.mxu0 %v1126_v48 }
  0x24   :  { %1131 = vmatprep.subr.bf16.mxu0 %v1130_v53 }
  0x26   :  { %1075 = vmatmul.mubr.f32.vlgmr.msra.gmra.mrb[0].mxu0 %v894_v35 }
  0x27   :  { %1077 = vmatprep.mubr.f32.mxu0 %v897_v42  ;;  %1133 = vmatpush3.bf16.msra.mxu0 %v1132_v57 }
  0x28   :  { %1135 = vmatprep.subr.bf16.mxu0 %v1134_v58  ;;  %v310_v58 = vld [vmem:[#allocation3 + $0x60] sm:$0xff] }
  0x2a   :  { %1078 = vmatmul.mubr.f32.gmra.mrb[2].mxu0 %v898_v47 }
  0x2b   :  { %1080 = vmatprep.mubr.f32.mxu0 %v901_v4  ;;  %v661_v4 = vld [vmem:[%s1621_s3 + $0xb8] sm:$0xff]  ;;  %1137 = vmatpush3.bf16.msra.mxu0 %v1136_v63 }
  0x2c   :  { %1139 = vmatprep.subr.bf16.mxu0 %v1138_v0 }
  0x2e   :  { %1081 = vmatmul.mubr.f32.gmra.mrb[4].mxu0 %v902_v9  ;;  %v662_v9 = vld [vmem:[%s1621_s3 + $0xc0] sm:$0xff] }
  0x2f   :  { %1083 = vmatprep.mubr.f32.mxu0 %v905_v3  ;;  %v660_v3 = vld [vmem:[%s1621_s3 + $0xb0] sm:$0xff]  ;;  %1141 = vmatpush3.bf16.msra.mxu0 %v1140_v5  ;;  %v1146_v12 = vpack.c.bf16 %v663_v10, %v662_v9  ;;  %v299_v5 = vld [vmem:[#allocation3 + $0x8] sm:$0xff] }
  0x30   :  { %v1142_v6 = vpack.c.bf16 %v661_v4, %v660_v3  ;;  %v311_v4 = vld [vmem:[#allocation3 + $0x68] sm:$0xff] }
  0x32   :  { %1084 = vmatmul.mubr.f32.gmra.mrb[6].mxu0 %v906_v8  ;;  %v645_v8 = vld [vmem:[%s1621_s3 + $0x38] sm:$0xff]  ;;  %1165 = vmatprep.subr.bf16.mxu1 %v1142_v6 }
  0x33   :  { %1086 = vmatprep.mubr.f32.mxu0 %v909_v19  ;;  %v1144_v11 = vpack.c.bf16 %v645_v8, %v644_v7  ;;  %1143 = vmatprep.subr.bf16.mxu0 %v1142_v6  ;;  %v1150_v19 = vpack.c.bf16 %v665_v17, %v664_v16 }
  0x35   :  { %1173 = vmatpush3.bf16.msra.mxu1 %v1144_v11  ;;  %1145 = vmatpush3.bf16.msra.mxu0 %v1144_v11 }
  0x36   :  { %1087 = vmatmul.mubr.f32.gmra.mrb[8].mxu0 %v910_v18  ;;  %1166 = vmatprep.subr.bf16.mxu1 %v1146_v12  ;;  %v648_v18 = vld [vmem:[%s1621_s3 + $0x50] sm:$0xff] }
  0x37   :  { %1089 = vmatprep.mubr.f32.mxu0 %v913_v25  ;;  %1147 = vmatprep.subr.bf16.mxu0 %v1146_v12  ;;  %v1152_v21 = vpack.c.bf16 %v649_v20, %v648_v18  ;;  %v1154_v25 = vpack.c.bf16 %v667_v23, %v666_v22  ;;  %v652_v12 = vld [vmem:[%s1621_s3 + $0x70] sm:$0xff] }
  0x38   :  { %v1160_v16 = vpack.c.bf16 %v653_v13, %v652_v12 }
  0x39   :  { %1174 = vmatpush3.bf16.msra.mxu1 %v1148_v15  ;;  %1149 = vmatpush3.bf16.msra.mxu0 %v1148_v15  ;;  %v300_v15 = vld [vmem:[#allocation3 + $0x10] sm:$0xff] }
  0x3a   :  { %1090 = vmatmul.mubr.f32.gmra.mrb[10].mxu0 %v914_v24  ;;  %1167 = vmatprep.subr.bf16.mxu1 %v1150_v19  ;;  %v650_v24 = vld [vmem:[%s1621_s3 + $0x60] sm:$0xff] }
  0x3b   :  { %1092 = vmatprep.mubr.f32.mxu0 %v917_v30  ;;  %1151 = vmatprep.subr.bf16.mxu0 %v1150_v19  ;;  %v1156_v27 = vpack.c.bf16 %v651_v26, %v650_v24  ;;  %v1158_v30 = vpack.c.bf16 %v669_v29, %v668_v28  ;;  %v313_v24 = vld [vmem:[#allocation3 + $0x78] sm:$0xff] }
  0x3c   :  { %v301_v26 = vld [vmem:[#allocation3 + $0x18] sm:$0xff] }
  0x3d   :  { %1175 = vmatpush3.bf16.msra.mxu1 %v1152_v21  ;;  %1153 = vmatpush3.bf16.msra.mxu0 %v1152_v21 }
  0x3e   :  { %1093 = vmatmul.mubr.f32.gmra.mrb[12].mxu0 %v918_v34  ;;  %1168 = vmatprep.subr.bf16.mxu1 %v1154_v25 }
  0x3f   :  { %1095 = vmatprep.mubr.f32.mxu0 %v921_v41  ;;  %1155 = vmatprep.subr.bf16.mxu0 %v1154_v25 }
  0x41   :  { %1176 = vmatpush3.bf16.msra.mxu1 %v1156_v27  ;;  %1157 = vmatpush3.bf16.msra.mxu0 %v1156_v27 }
  0x42   :  { %1096 = vmatmul.mubr.f32.gmra.mrb[14].mxu0 %v922_v46  ;;  %1169 = vmatprep.subr.bf16.mxu1 %v1158_v30 }
  0x43   :  { %1159 = vmatprep.subr.bf16.mxu0 %v1158_v30 }
  0x45   :  { %1177 = vmatpush3.bf16.msra.mxu1 %v1160_v16  ;;  %1161 = vmatpush3.bf16.msra.mxu0 %v1160_v16 }
  0x91   :  { %v327_v33 = vpop.xlane.xlu1 %326  ;;  %v323_v34 = vpop.xlane.xlu0 %322 }
  0x92   :  { %v352_v35 = vadd.f32 %v327_v33, %v304_v31  ;;  %v350_v36 = vadd.f32 %v323_v34, %v302_v32 }
  0x94   :  { %369 = vst.msk [vmem:[#allocation3 + $0x30] sm:$0xff] %vm40_vm0, %v352_v35  ;;  %367 = vst.msk [vmem:[#allocation3 + $0x20] sm:$0xff] %vm40_vm0, %v350_v36 }
  0x95   :  { %v329_v39 = vpop.xlane.xlu1 %328  ;;  %v325_v40 = vpop.xlane.xlu0 %324 }
  0x96   :  { %v353_v41 = vadd.f32 %v329_v39, %v305_v37  ;;  %v351_v42 = vadd.f32 %v325_v40, %v303_v38 }
  0x98   :  { %370 = vst.msk [vmem:[#allocation3 + $0x38] sm:$0xff] %vm40_vm0, %v353_v41  ;;  %368 = vst.msk [vmem:[#allocation3 + $0x28] sm:$0xff] %vm40_vm0, %v351_v42 }
  0x99   :  { %v333_v45 = vpop.xlane.xlu1 %332  ;;  %v331_v46 = vpop.xlane.xlu0 %330 }
  0x9a   :  { %v355_v47 = vadd.f32 %v333_v45, %v307_v43  ;;  %v354_v48 = vadd.f32 %v331_v46, %v306_v44 }
  0x9b   :  { %v386_v51 = vld [vmem:[#allocation3 + $0x20] sm:$0xff]  ;;  %v388_v55 = vld [vmem:[#allocation3 + $0x30] sm:$0xff] }
  0x9c   :  { %372 = vst.msk [vmem:[#allocation3 + $0x48] sm:$0xff] %vm40_vm0, %v355_v47  ;;  %371 = vst.msk [vmem:[#allocation3 + $0x40] sm:$0xff] %vm40_vm0, %v354_v48  ;;  %v402_v52 = vmax.f32 %v386_v51, 1.0  ;;  %v404_v62 = vmax.f32 %v388_v55, 1.0 }
  0x9d   :  { %v337_v53 = vpop.xlane.xlu1 %336  ;;  %v335_v54 = vpop.xlane.xlu0 %334 }
  0x9e   :  { %v357_v56 = vadd.f32 %v337_v53, %v309_v49  ;;  %v356_v57 = vadd.f32 %v335_v54, %v308_v50  ;;  %1182 = vrcp.f32 %v402_v52 }
  0x9f   :  { %v387_v59 = vld [vmem:[#allocation3 + $0x28] sm:$0xff]  ;;  %v389_v1 = vld [vmem:[#allocation3 + $0x38] sm:$0xff] }
  0xa0   :  { %374 = vst.msk [vmem:[#allocation3 + $0x58] sm:$0xff] %vm40_vm0, %v357_v56  ;;  %373 = vst.msk [vmem:[#allocation3 + $0x50] sm:$0xff] %vm40_vm0, %v356_v57  ;;  %v403_v61 = vmax.f32 %v387_v59, 1.0  ;;  %v405_v6 = vmax.f32 %v389_v1, 1.0 }
  0xa1   :  { %v339_v63 = vpop.xlane.xlu1 %338  ;;  %v315_v0 = vpop.xlane.xlu0 %314 }
  0xa2   :  { %v358_v2 = vadd.f32 %v339_v63, %v310_v58  ;;  %1184 = vrcp.f32 %v403_v61  ;;  %v346_v3 = vadd.f32 %v315_v0, %v298_v60 }
  0xa3   :  { %1186 = vrcp.f32 %v404_v62  ;;  %v390_v9 = vld [vmem:[#allocation3 + $0x40] sm:$0xff]  ;;  %v391_v21 = vld [vmem:[#allocation3 + $0x48] sm:$0xff] }
  0xa4   :  { %375 = vst.msk [vmem:[#allocation3 + $0x60] sm:$0xff] %vm40_vm0, %v358_v2  ;;  %363 = vst.msk [vmem:[#allocation3] sm:$0xff] %vm40_vm0, %v346_v3  ;;  %1188 = vrcp.f32 %v405_v6  ;;  %v406_v18 = vmax.f32 %v390_v9, 1.0  ;;  %v407_v29 = vmax.f32 %v391_v21, 1.0 }
  0xa5   :  { %v341_v7 = vpop.xlane.xlu1 %340  ;;  %v317_v8 = vpop.xlane.xlu0 %316 }
  0xa6   :  { %v359_v10 = vadd.f32 %v341_v7, %v311_v4  ;;  %v347_v11 = vadd.f32 %v317_v8, %v299_v5  ;;  %1190 = vrcp.f32 %v406_v18 }
  0xa7   :  { %v392_v32 = vld [vmem:[#allocation3 + $0x50] sm:$0xff]  ;;  %v393_v39 = vld [vmem:[#allocation3 + $0x58] sm:$0xff] }
  0xa8   :  { %v1183_v17 = vpop.eup %1182  ;;  %376 = vst.msk [vmem:[#allocation3 + $0x68] sm:$0xff] %vm40_vm0, %v359_v10  ;;  %364 = vst.msk [vmem:[#allocation3 + $0x8] sm:$0xff] %vm40_vm0, %v347_v11  ;;  %v408_v38 = vmax.f32 %v392_v32, 1.0  ;;  %v409_v43 = vmax.f32 %v393_v39, 1.0  ;;  %v566_v32 = vld [vmem:[%s1622_s2 + $0x40] sm:$0xff]  ;;  %v568_v39 = vld [vmem:[%s1622_s2 + $0x50] sm:$0xff] }
  0xa9   :  { %v343_v19 = vpop.xlane.xlu1 %342  ;;  %484 = vperm.xlu0 %1180, %v1183_v17   ;;  %v319_v20 = vpop.xlane.xlu0 %318 }
  0xaa   :  { %v360_v22 = vadd.f32 %v343_v19, %v312_v14  ;;  %v348_v23 = vadd.f32 %v319_v20, %v300_v15  ;;  %v562_v20 = vld [vmem:[%s1622_s2 + $0x20] sm:$0xff] }
  0xab   :  { %v394_v25 = vld [vmem:[#allocation3 + $0x60] sm:$0xff] }
  0xac   :  { %v1185_v27 = vpop.eup %1184  ;;  %377 = vst.msk [vmem:[#allocation3 + $0x70] sm:$0xff] %vm40_vm0, %v360_v22  ;;  %v410_v28 = vmax.f32 %v394_v25, 1.0  ;;  %365 = vst.msk [vmem:[#allocation3 + $0x10] sm:$0xff] %vm40_vm0, %v348_v23  ;;  %v382_v44 = vld [vmem:[#allocation3] sm:$0xff]  ;;  %v563_v23 = vld [vmem:[%s1622_s2 + $0x28] sm:$0xff] }
  0xad   :  { %v345_v30 = vpop.xlane.xlu1 %344  ;;  %489 = vperm.xlu1 %1181, %v1185_v27   ;;  %v321_v31 = vpop.xlane.xlu0 %320  ;;  %v398_v49 = vmax.f32 %v382_v44, 1.0 }
  0xae   :  { %v1187_v33 = vpop.eup %1186  ;;  %v361_v34 = vadd.f32 %v345_v30, %v313_v24  ;;  %1192 = vrcp.f32 %v410_v28  ;;  %v349_v35 = vadd.f32 %v321_v31, %v301_v26  ;;  %v564_v26 = vld [vmem:[%s1622_s2 + $0x30] sm:$0xff] }
  0xaf   :  { %v395_v36 = vld [vmem:[#allocation3 + $0x68] sm:$0xff]  ;;  %1194 = vrcp.f32 %v407_v29  ;;  %v1189_v40 = vpop.eup %1188  ;;  %v565_v29 = vld [vmem:[%s1622_s2 + $0x38] sm:$0xff] }
  0xb0   :  { %378 = vst.msk [vmem:[#allocation3 + $0x78] sm:$0xff] %vm40_vm0, %v361_v34  ;;  %v411_v37 = vmax.f32 %v395_v36, 1.0  ;;  %366 = vst.msk [vmem:[#allocation3 + $0x18] sm:$0xff] %vm40_vm0, %v349_v35  ;;  %v1191_v45 = vpop.eup %1190  ;;  %v383_v50 = vld [vmem:[#allocation3 + $0x8] sm:$0xff] }
  0xb1   :  { %494 = vperm.xlu1 %1181, %v1187_v33   ;;  %v399_v53 = vmax.f32 %v383_v50, 1.0  ;;  %v567_v35 = vld [vmem:[%s1622_s2 + $0x48] sm:$0xff] }
  0xb2   :  { %1196 = vrcp.f32 %v411_v37 }
  0xb3   :  { %v396_v41 = vld [vmem:[#allocation3 + $0x70] sm:$0xff]  ;;  %1198 = vrcp.f32 %v408_v38 }
  0xb4   :  { %v412_v42 = vmax.f32 %v396_v41, 1.0  ;;  %v384_v54 = vld [vmem:[#allocation3 + $0x10] sm:$0xff] }
  0xb5   :  { %499 = vperm.xlu1 %1181, %v1189_v40   ;;  %v400_v57 = vmax.f32 %v384_v54, 1.0  ;;  %v571_v54 = vld [vmem:[%s1622_s2 + $0x68] sm:$0xff] }
  0xb6   :  { %1200 = vrcp.f32 %v412_v42 }
  0xb7   :  { %v397_v46 = vld [vmem:[#allocation3 + $0x78] sm:$0xff]  ;;  %1202 = vrcp.f32 %v409_v43 }
  0xb8   :  { %v1193_v47 = vpop.eup %1192  ;;  %v413_v48 = vmax.f32 %v397_v46, 1.0  ;;  %v385_v58 = vld [vmem:[#allocation3 + $0x18] sm:$0xff] }
  0xb9   :  { %504 = vperm.xlu1 %1181, %v1191_v45   ;;  %524 = vperm.xlu0 %1180, %v1193_v47   ;;  %v1195_v51 = vpop.eup %1194  ;;  %v401_v61 = vmax.f32 %v385_v58, 1.0  ;;  %v569_v43 = vld [vmem:[%s1622_s2 + $0x58] sm:$0xff]  ;;  %v558_v47 = vld [vmem:[%s1622_s2] sm:$0xff] }
  0xba   :  { %1204 = vrcp.f32 %v413_v48  ;;  %v570_v48 = vld [vmem:[%s1622_s2 + $0x60] sm:$0xff] }
  0xbb   :  { %1206 = vrcp.f32 %v398_v49 }
  0xbc   :  { %v1197_v52 = vpop.eup %1196  ;;  %1208 = vrcp.f32 %v399_v53  ;;  %v559_v53 = vld [vmem:[%s1622_s2 + $0x8] sm:$0xff] }
  0xbd   :  { %509 = vperm.xlu1 %1181, %v1195_v51   ;;  %529 = vperm.xlu0 %1180, %v1197_v52   ;;  %v1199_v55 = vpop.eup %1198  ;;  %1210 = vrcp.f32 %v400_v57 }
  0xbe   :  { %1212 = vrcp.f32 %v401_v61 }
  0xc0   :  { %v1201_v56 = vpop.eup %1200 }
  0xc1   :  { %514 = vperm.xlu1 %1181, %v1199_v55   ;;  %534 = vperm.xlu0 %1180, %v1201_v56   ;;  %v1203_v59 = vpop.eup %1202 }
  0xc4   :  { %v1205_v60 = vpop.eup %1204 }
  0xc5   :  { %519 = vperm.xlu1 %1181, %v1203_v59   ;;  %539 = vperm.xlu0 %1180, %v1205_v60   ;;  %v1207_v62 = vpop.eup %1206  ;;  %v560_v59 = vld [vmem:[%s1622_s2 + $0x10] sm:$0xff] }
  0xc6   :  { %v1209_v63 = vpop.eup %1208  ;;  %v572_v60 = vld [vmem:[%s1622_s2 + $0x70] sm:$0xff] }
  0xc7   :  { %v1211_v0 = vpop.eup %1210 }
  0xc8   :  { %v1213_v1 = vpop.eup %1212 }
  0xc9   :  { %464 = vperm.xlu1 %1181, %v1207_v62  }
  0xcd   :  { %469 = vperm.xlu1 %1181, %v1209_v63  }
  0xd1   :  { %474 = vperm.xlu1 %1181, %v1211_v0   ;;  %v561_v0 = vld [vmem:[%s1622_s2 + $0x18] sm:$0xff] }
  0xd5   :  { %479 = vperm.xlu1 %1181, %v1213_v1   ;;  %v573_v1 = vld [vmem:[%s1622_s2 + $0x78] sm:$0xff] }
  0xf9   :  { %v1490_v2 = vpop.f32.mrb[0].mxu0 }
  0xfa   :  { %v187_v3 = vpop.f32.mrb[1].mxu0 }
  0xfd   :  { %v1492_v4 = vpop.f32.mrb[2].mxu0 }
  0xfe   :  { %v1494_v5 = vpop.f32.mrb[3].mxu0 }
 0x101   :  { %v1082_v6 = vpop.f32.mrb[4].mxu0 }
 0x102   :  { %v207_v7 = vpop.f32.mrb[5].mxu0 }
 0x105   :  { %v1085_v8 = vpop.f32.mrb[6].mxu0 }
 0x106   :  { %v217_v9 = vpop.f32.mrb[7].mxu0 }
 0x109   :  { %v1088_v10 = vpop.f32.mrb[8].mxu0 }
 0x10a   :  { %v227_v11 = vpop.f32.mrb[9].mxu0 }
 0x10d   :  { %v1091_v12 = vpop.f32.mrb[10].mxu0 }
 0x10e   :  { %v237_v13 = vpop.f32.mrb[11].mxu0 }
 0x111   :  { %v1094_v14 = vpop.f32.mrb[12].mxu0 }
 0x112   :  { %v247_v15 = vpop.f32.mrb[13].mxu0 }
 0x115   :  { %v1496_v16 = vpop.f32.mrb[14].mxu0 }
 0x116   :  { %v257_v17 = vpop.f32.mrb[15].mxu0 }
 0x128   :  { %v485_v18 = vpop.permute.xlu0 %484 }
 0x129   :  { %v546_v19 = vmul.f32 %v485_v18, %v207_v7 }
 0x12b   :  { %761 = vmatprep.mubr.f32.mxu1 %v546_v19 }
 0x12c   :  { %v490_v21 = vpop.permute.xlu1 %489  ;;  %762 = vmatmul.mubr.f32.vlgmr.msra.gmra.mrb[0].mxu1 %v562_v20 }
 0x12d   :  { %v547_v22 = vmul.f32 %v1082_v6, %v490_v21 }
 0x12f   :  { %766 = vmatprep.mubr.f32.mxu1 %v547_v22 }
 0x130   :  { %v495_v24 = vpop.permute.xlu1 %494  ;;  %767 = vmatmul.mubr.f32.gmra.mrb[2].mxu1 %v563_v23 }
 0x131   :  { %v548_v25 = vmul.f32 %v495_v24, %v217_v9 }
 0x133   :  { %771 = vmatprep.mubr.f32.mxu1 %v548_v25 }
 0x134   :  { %v500_v27 = vpop.permute.xlu1 %499  ;;  %772 = vmatmul.mubr.f32.gmra.mrb[4].mxu1 %v564_v26 }
 0x135   :  { %v549_v28 = vmul.f32 %v1085_v8, %v500_v27 }
 0x137   :  { %776 = vmatprep.mubr.f32.mxu1 %v549_v28 }
 0x138   :  { %v505_v30 = vpop.permute.xlu1 %504  ;;  %777 = vmatmul.mubr.f32.gmra.mrb[6].mxu1 %v565_v29  ;;  %v525_v36 = vpop.permute.xlu0 %524 }
 0x139   :  { %v550_v31 = vmul.f32 %v505_v30, %v227_v11  ;;  %v554_v44 = vmul.f32 %v525_v36, %v247_v15 }
 0x13b   :  { %781 = vmatprep.mubr.f32.mxu1 %v550_v31 }
 0x13c   :  { %v510_v33 = vpop.permute.xlu1 %509  ;;  %782 = vmatmul.mubr.f32.gmra.mrb[8].mxu1 %v566_v32  ;;  %v530_v40 = vpop.permute.xlu0 %529 }
 0x13d   :  { %v551_v34 = vmul.f32 %v1088_v10, %v510_v33  ;;  %v555_v50 = vmul.f32 %v1094_v14, %v530_v40 }
 0x13f   :  { %786 = vmatprep.mubr.f32.mxu1 %v551_v34 }
 0x140   :  { %v515_v37 = vpop.permute.xlu1 %514  ;;  %787 = vmatmul.mubr.f32.gmra.mrb[10].mxu1 %v567_v35  ;;  %v535_v49 = vpop.permute.xlu0 %534 }
 0x141   :  { %v552_v38 = vmul.f32 %v515_v37, %v237_v13  ;;  %v556_v55 = vmul.f32 %v535_v49, %v257_v17 }
 0x143   :  { %791 = vmatprep.mubr.f32.mxu1 %v552_v38 }
 0x144   :  { %v520_v41 = vpop.permute.xlu1 %519  ;;  %792 = vmatmul.mubr.f32.gmra.mrb[12].mxu1 %v568_v39  ;;  %v540_v56 = vpop.permute.xlu0 %539 }
 0x145   :  { %v553_v42 = vmul.f32 %v1091_v12, %v520_v41  ;;  %v557_v61 = vmul.f32 %v1496_v16, %v540_v56 }
 0x147   :  { %796 = vmatprep.mubr.f32.mxu1 %v553_v42 }
 0x148   :  { %v465_v45 = vpop.permute.xlu1 %464  ;;  %797 = vmatmul.mubr.f32.gmra.mrb[14].mxu1 %v569_v43 }
 0x149   :  { %v542_v46 = vmul.f32 %v465_v45, %v187_v3  ;;  %801 = vmatprep.mubr.f32.mxu1 %v554_v44  ;;  %v1553_v3 = vld [vmem:[%s1623_s4] ss:$0 sm:$0xff] }
 0x14b   :  { %741 = vmatprep.mubr.f32.mxu0 %v542_v46 }
 0x14c   :  { %v470_v51 = vpop.permute.xlu1 %469  ;;  %742 = vmatmul.mubr.f32.vlgmr.msra.gmra.mrb[16].mxu0 %v558_v47  ;;  %802 = vmatmul.mubr.f32.gmra.mrb[16].mxu1 %v570_v48 }
 0x14d   :  { %v543_v52 = vmul.f32 %v1490_v2, %v470_v51  ;;  %806 = vmatprep.mubr.f32.mxu1 %v555_v50 }
 0x14f   :  { %746 = vmatprep.mubr.f32.mxu0 %v543_v52 }
 0x150   :  { %v475_v57 = vpop.permute.xlu1 %474  ;;  %747 = vmatmul.mubr.f32.gmra.mrb[18].mxu0 %v559_v53  ;;  %807 = vmatmul.mubr.f32.gmra.mrb[18].mxu1 %v571_v54 }
 0x151   :  { %v544_v58 = vmul.f32 %v475_v57, %v1494_v5  ;;  %811 = vmatprep.mubr.f32.mxu1 %v556_v55 }
 0x153   :  { %751 = vmatprep.mubr.f32.mxu0 %v544_v58 }
 0x154   :  { %v480_v62 = vpop.permute.xlu1 %479  ;;  %752 = vmatmul.mubr.f32.gmra.mrb[20].mxu0 %v560_v59  ;;  %812 = vmatmul.mubr.f32.gmra.mrb[20].mxu1 %v572_v60 }
 0x155   :  { %v545_v63 = vmul.f32 %v1492_v4, %v480_v62  ;;  %816 = vmatprep.mubr.f32.mxu1 %v557_v61 }
 0x157   :  { %756 = vmatprep.mubr.f32.mxu0 %v545_v63 }
 0x158   :  { %757 = vmatmul.mubr.f32.gmra.mrb[22].mxu0 %v561_v0  ;;  %817 = vmatmul.mubr.f32.gmra.mrb[22].mxu1 %v573_v1 }
 0x1ff   :  { %v1006_v2 = vpop.f32.mrb[0].mxu1 }
 0x200   :  { %v1007_v5 = vpop.f32.mrb[1].mxu1 }
 0x201   :  { %v1008_v4 = vadd.f32 %v1007_v5, %v1006_v2 }
 0x203   :  { %v764_v6 = vadd.f32 %v1008_v4, %v1553_v3  ;;  %v1009_v7 = vpop.f32.mrb[2].mxu1 }
 0x204   :  { %v1010_v8 = vpop.f32.mrb[3].mxu1 }
 0x205   :  { %vm826_vm1 = vcmp.gt.f32.partialorder %v764_v6, 0.0  ;;  %v842_v9 = vmul.f32 0.01, %v764_v6  ;;  %v1011_v10 = vadd.f32 %v1010_v8, %v1009_v7 }
 0x207   :  { %v858_v11 = vsel %vm826_vm1, %v764_v6, %v842_v9  ;;  %v769_v12 = vadd.f32 %v1011_v10, %v1553_v3  ;;  %v1012_v13 = vpop.f32.mrb[4].mxu1 }
 0x208   :  { %874 = vst [vmem:[%s1624_s5 + $0x20] sm:$0xff] %v858_v11  ;;  %v1013_v14 = vpop.f32.mrb[5].mxu1 }
 0x209   :  { %vm827_vm2 = vcmp.gt.f32.partialorder %v769_v12, 0.0  ;;  %v843_v15 = vmul.f32 0.01, %v769_v12  ;;  %v1014_v16 = vadd.f32 %v1013_v14, %v1012_v13 }
 0x20b   :  { %v859_v17 = vsel %vm827_vm2, %v769_v12, %v843_v15  ;;  %v774_v18 = vadd.f32 %v1014_v16, %v1553_v3  ;;  %v1015_v19 = vpop.f32.mrb[6].mxu1 }
 0x20c   :  { %875 = vst [vmem:[%s1624_s5 + $0x28] sm:$0xff] %v859_v17  ;;  %v1016_v20 = vpop.f32.mrb[7].mxu1 }
 0x20d   :  { %vm828_vm3 = vcmp.gt.f32.partialorder %v774_v18, 0.0  ;;  %v844_v21 = vmul.f32 0.01, %v774_v18  ;;  %v1017_v22 = vadd.f32 %v1016_v20, %v1015_v19 }
 0x20f   :  { %v860_v23 = vsel %vm828_vm3, %v774_v18, %v844_v21  ;;  %v779_v24 = vadd.f32 %v1017_v22, %v1553_v3  ;;  %v1018_v25 = vpop.f32.mrb[8].mxu1 }
 0x210   :  { %876 = vst [vmem:[%s1624_s5 + $0x30] sm:$0xff] %v860_v23  ;;  %v1019_v26 = vpop.f32.mrb[9].mxu1 }
 0x211   :  { %vm829_vm4 = vcmp.gt.f32.partialorder %v779_v24, 0.0  ;;  %v845_v27 = vmul.f32 0.01, %v779_v24  ;;  %v1020_v28 = vadd.f32 %v1019_v26, %v1018_v25 }
 0x213   :  { %v861_v29 = vsel %vm829_vm4, %v779_v24, %v845_v27  ;;  %v784_v30 = vadd.f32 %v1020_v28, %v1553_v3  ;;  %v1021_v31 = vpop.f32.mrb[10].mxu1 }
 0x214   :  { %877 = vst [vmem:[%s1624_s5 + $0x38] sm:$0xff] %v861_v29  ;;  %v1022_v32 = vpop.f32.mrb[11].mxu1 }
 0x215   :  { %vm830_vm5 = vcmp.gt.f32.partialorder %v784_v30, 0.0  ;;  %v846_v33 = vmul.f32 0.01, %v784_v30  ;;  %v1023_v34 = vadd.f32 %v1022_v32, %v1021_v31 }
 0x217   :  { %v862_v35 = vsel %vm830_vm5, %v784_v30, %v846_v33  ;;  %v789_v36 = vadd.f32 %v1023_v34, %v1553_v3  ;;  %v1024_v37 = vpop.f32.mrb[12].mxu1 }
 0x218   :  { %878 = vst [vmem:[%s1624_s5 + $0x40] sm:$0xff] %v862_v35  ;;  %v1025_v38 = vpop.f32.mrb[13].mxu1 }
 0x219   :  { %vm831_vm6 = vcmp.gt.f32.partialorder %v789_v36, 0.0  ;;  %v847_v39 = vmul.f32 0.01, %v789_v36  ;;  %v1026_v40 = vadd.f32 %v1025_v38, %v1024_v37 }
 0x21b   :  { %v863_v41 = vsel %vm831_vm6, %v789_v36, %v847_v39  ;;  %v794_v42 = vadd.f32 %v1026_v40, %v1553_v3  ;;  %v1027_v43 = vpop.f32.mrb[14].mxu1 }
 0x21c   :  { %879 = vst [vmem:[%s1624_s5 + $0x48] sm:$0xff] %v863_v41  ;;  %v1028_v44 = vpop.f32.mrb[15].mxu1 }
 0x21d   :  { %vm832_vm7 = vcmp.gt.f32.partialorder %v794_v42, 0.0  ;;  %v848_v45 = vmul.f32 0.01, %v794_v42  ;;  %v1029_v46 = vadd.f32 %v1028_v44, %v1027_v43 }
 0x21f   :  { %v864_v47 = vsel %vm832_vm7, %v794_v42, %v848_v45  ;;  %v799_v48 = vadd.f32 %v1029_v46, %v1553_v3  ;;  %v994_v49 = vpop.f32.mrb[16].mxu0  ;;  %v1030_v50 = vpop.f32.mrb[16].mxu1 }
 0x220   :  { %880 = vst [vmem:[%s1624_s5 + $0x50] sm:$0xff] %v864_v47  ;;  %v995_v51 = vpop.f32.mrb[17].mxu0  ;;  %v1031_v52 = vpop.f32.mrb[17].mxu1 }
 0x221   :  { %vm833_vm8 = vcmp.gt.f32.partialorder %v799_v48, 0.0  ;;  %v849_v53 = vmul.f32 0.01, %v799_v48  ;;  %v996_v54 = vadd.f32 %v995_v51, %v994_v49  ;;  %v1032_v55 = vadd.f32 %v1031_v52, %v1030_v50 }
 0x223   :  { %v865_v56 = vsel %vm833_vm8, %v799_v48, %v849_v53  ;;  %v744_v57 = vadd.f32 %v996_v54, %v1553_v3  ;;  %v804_v58 = vadd.f32 %v1032_v55, %v1553_v3  ;;  %v997_v59 = vpop.f32.mrb[18].mxu0  ;;  %v1033_v60 = vpop.f32.mrb[18].mxu1 }
 0x224   :  { %881 = vst [vmem:[%s1624_s5 + $0x58] sm:$0xff] %v865_v56  ;;  %v998_v61 = vpop.f32.mrb[19].mxu0  ;;  %v1034_v62 = vpop.f32.mrb[19].mxu1 }
 0x225   :  { %vm822_vm9 = vcmp.gt.f32.partialorder %v744_v57, 0.0  ;;  %v838_v63 = vmul.f32 0.01, %v744_v57  ;;  %vm834_vm10 = vcmp.gt.f32.partialorder %v804_v58, 0.0  ;;  %v850_v0 = vmul.f32 0.01, %v804_v58 }
 0x226   :  { %v999_v1 = vadd.f32 %v998_v61, %v997_v59  ;;  %v1035_v2 = vadd.f32 %v1034_v62, %v1033_v60 }
 0x227   :  { %v854_v5 = vsel %vm822_vm9, %v744_v57, %v838_v63  ;;  %v866_v4 = vsel %vm834_vm10, %v804_v58, %v850_v0  ;;  %v1000_v6 = vpop.f32.mrb[20].mxu0  ;;  %v1036_v7 = vpop.f32.mrb[20].mxu1 }
 0x228   :  { %870 = vst [vmem:[%s1624_s5] sm:$0xff] %v854_v5  ;;  %882 = vst [vmem:[%s1624_s5 + $0x60] sm:$0xff] %v866_v4  ;;  %v749_v8 = vadd.f32 %v999_v1, %v1553_v3  ;;  %v809_v9 = vadd.f32 %v1035_v2, %v1553_v3  ;;  %v1001_v10 = vpop.f32.mrb[21].mxu0  ;;  %v1037_v11 = vpop.f32.mrb[21].mxu1 }
 0x229   :  { %v1002_v12 = vadd.f32 %v1001_v10, %v1000_v6  ;;  %v1038_v13 = vadd.f32 %v1037_v11, %v1036_v7 }
 0x22a   :  { %vm823_vm11 = vcmp.gt.f32.partialorder %v749_v8, 0.0  ;;  %v839_v14 = vmul.f32 0.01, %v749_v8  ;;  %vm835_vm12 = vcmp.gt.f32.partialorder %v809_v9, 0.0  ;;  %v851_v15 = vmul.f32 0.01, %v809_v9 }
 0x22b   :  { %v754_v16 = vadd.f32 %v1002_v12, %v1553_v3  ;;  %v814_v17 = vadd.f32 %v1038_v13, %v1553_v3  ;;  %v1003_v18 = vpop.f32.mrb[22].mxu0  ;;  %v1039_v19 = vpop.f32.mrb[22].mxu1 }
 0x22c   :  { %v855_v20 = vsel %vm823_vm11, %v749_v8, %v839_v14  ;;  %v867_v21 = vsel %vm835_vm12, %v809_v9, %v851_v15  ;;  %v1004_v22 = vpop.f32.mrb[23].mxu0  ;;  %v1040_v23 = vpop.f32.mrb[23].mxu1 }
 0x22d   :  { %871 = vst [vmem:[%s1624_s5 + $0x8] sm:$0xff] %v855_v20  ;;  %883 = vst [vmem:[%s1624_s5 + $0x68] sm:$0xff] %v867_v21  ;;  %vm824_vm13 = vcmp.gt.f32.partialorder %v754_v16, 0.0  ;;  %v840_v24 = vmul.f32 0.01, %v754_v16  ;;  %vm836_vm14 = vcmp.gt.f32.partialorder %v814_v17, 0.0  ;;  %v1005_v26 = vadd.f32 %v1004_v22, %v1003_v18 }
 0x22e   :  { %v852_v25 = vmul.f32 0.01, %v814_v17  ;;  %v1041_v27 = vadd.f32 %v1040_v23, %v1039_v19 }
 0x22f   :  { %v856_v28 = vsel %vm824_vm13, %v754_v16, %v840_v24  ;;  %v759_v30 = vadd.f32 %v1005_v26, %v1553_v3 }
 0x230   :  { %v868_v29 = vsel %vm836_vm14, %v814_v17, %v852_v25  ;;  %872 = vst [vmem:[%s1624_s5 + $0x10] sm:$0xff] %v856_v28  ;;  %v819_v31 = vadd.f32 %v1041_v27, %v1553_v3 }
 0x231   :  { %884 = vst [vmem:[%s1624_s5 + $0x70] sm:$0xff] %v868_v29  ;;  %vm825_vm15 = vcmp.gt.f32.partialorder %v759_v30, 0.0  ;;  %v841_v32 = vmul.f32 0.01, %v759_v30 }
 0x232   :  { %vm837_vm0 = vcmp.gt.f32.partialorder %v819_v31, 0.0  ;;  %v853_v33 = vmul.f32 0.01, %v819_v31 }
 0x233   :  { %v857_v34 = vsel %vm825_vm15, %v759_v30, %v841_v32 }
 0x234   :  { %v869_v35 = vsel %vm837_vm0, %v819_v31, %v853_v33  ;;  %873 = vst [vmem:[%s1624_s5 + $0x18] sm:$0xff] %v857_v34 }
 0x235   :  { %885 = vst [vmem:[%s1624_s5 + $0x78] sm:$0xff] %v869_v35 }

</bundles_post_ra>
